<compile_context>
chip_gen: v6e
topology: v6e:2x2x1
jax: 0.10.0
libtpu: 0.0.40
codegen_flags: <defaults>
</compile_context>

<pallas_src>
import jax
import jax.numpy as jnp
from jax.experimental import pallas as pl
from jax.experimental.pallas import tpu as pltpu

# ---- model hyper-parameters (small, but consistent with the module) ----------
N_FEATURES = 64      # module default 768 (shrunk)
HIDDEN     = 48      # module default 300 (shrunk, divisible by heads)
HEADS      = 6
HEAD_DIM   = HIDDEN // HEADS
N_LAYERS   = 2       # module default 8 (shrunk)
N_CLASSES  = 3
NEG_SLOPE  = 0.2     # PyG GATConv LeakyReLU negative_slope
HPAD       = 128     # lane-padded hidden width (48 -> 128, zero columns)
WCAT_COLS  = HIDDEN + 2 * HEADS   # [xw | a_dst | a_src] columns of combined weight
NEG_BIG    = -1e30

_VMEM = pltpu.MemorySpace.VMEM


# ------------------------------- fused kernel ----------------------------------
def ed_gnn_kernel(
    x_ref,        # (NPG, N_FEATURES)        this graph's node features
    adjb_ref,     # (1, NPG, NPG)            additive mask: 0 on edges, -1e30 else
    sel_ref,      # (1, 2, NPG)              row 0: a_mask, row 1: b_mask
    w0_ref, b0_ref,                          # start linear (lane-padded)
    wcat_ref,     # (L, HPAD, WCAT_COLS)     [W | W@Adst | W@Asrc] per layer
    bias_ref,     # (L, HPAD)                GAT output bias per layer
    wfa_ref, wfb_ref, bf_ref,                # final linear (pre-split, padded)
    o_ref,        # (1, 1, N_CLASSES)
):
    f32 = jnp.float32
    npg = x_ref.shape[0]

    adj_bias = adjb_ref[0]                   # (NPG, NPG), hoisted out of the layer loop
    sel = sel_ref[0]                         # (2, NPG)

    # F.dropout(p=0.3) is identity in eval mode.
    h = jnp.dot(x_ref[...], w0_ref[...], preferred_element_type=f32) + b0_ref[...]

    for l in range(N_LAYERS):                # unrolled at trace time (layers are sequential)
        # One weight-stationary push: [xw | a_dst | a_src] = h @ [W | W@Adst | W@Asrc]
        hw = jnp.dot(h, wcat_ref[l], preferred_element_type=f32)      # (NPG, 60)
        xw    = hw[:, :HIDDEN]                                        # (NPG, 48)
        a_dst = hw[:, HIDDEN:HIDDEN + HEADS]                          # (NPG, 6)
        a_src = hw[:, HIDDEN + HEADS:]                                # (NPG, 6)

        # e[hd, i, j] = a_dst[i, hd] + a_src[j, hd] ; LeakyReLU ; additive edge mask.
        e = a_dst.T[:, :, None] + a_src.T[:, None, :]                 # (HEADS, NPG, NPG)
        e = jnp.maximum(e, NEG_SLOPE * e)                             # LeakyReLU as one max
        e = e + adj_bias                                              # single vadd, no select
        m = jnp.max(e, axis=-1, keepdims=True)
        p = jnp.exp(e - m)                   # masked entries underflow to 0
        # Every row has >= 1 edge (self-loops added on the host), so sum > 0.
        alpha = p / jnp.sum(p, axis=-1, keepdims=True)                # exact division (parity)

        # Flop-correct per-head aggregation:
        #   out[:, head hd cols] = alpha[hd] @ xw[:, head hd cols]
        # bf16 at the dot inputs (MXU-native), f32 accumulation; lane-concat keeps
        # the per-layer activation lane-dense.
        alpha_b = alpha.astype(jnp.bfloat16)
        xw_b = xw.astype(jnp.bfloat16)
        head_outs = [
            jnp.dot(alpha_b[hd], xw_b[:, hd * HEAD_DIM:(hd + 1) * HEAD_DIM],
                    preferred_element_type=f32)
            for hd in range(HEADS)
        ]
        out = jnp.concatenate(
            head_outs + [jnp.zeros((npg, HPAD - HIDDEN), f32)], axis=-1)   # (NPG, HPAD)
        out = out + bias_ref[l:l + 1, :]
        # ELU (alpha=1); clamp exp arg so the discarded branch never makes inf.
        h = jnp.where(out > 0.0, out, jnp.exp(jnp.minimum(out, 0.0)) - 1.0)

    # ---- masked per-graph means over a/b node sets, concat, final linear + softmax
    sums = jnp.dot(sel, h, preferred_element_type=f32)                # (2, HPAD)
    cnts = jnp.sum(sel, axis=1, keepdims=True)                        # (2, 1)
    # empty mask -> mean is NaN -> nan_to_num() -> 0 ; reproduced exactly:
    means = jnp.where(cnts > 0.0, sums / jnp.maximum(cnts, 1.0), 0.0)

    logits = (jnp.dot(means[0:1], wfa_ref[...], preferred_element_type=f32)
              + jnp.dot(means[1:2], wfb_ref[...], preferred_element_type=f32)
              + bf_ref[...])                                          # (1, N_CLASSES)
    lm = jnp.max(logits, axis=1, keepdims=True)
    ex = jnp.exp(logits - lm)
    o_ref[0] = ex / jnp.sum(ex, axis=1, keepdims=True)                # exact softmax


# ------------------------------ wrapper ----------------------------------------
def ed_gnn_forward(params, x, adj_bias, sel):
    n_graphs = sel.shape[0]
    npg = x.shape[0] // n_graphs             # uniform nodes-per-graph (toy); see TODO above

    full = lambda: pl.BlockSpec(memory_space=_VMEM)   # whole array VMEM-resident

    out = pl.pallas_call(
        ed_gnn_kernel,
        out_shape=jax.ShapeDtypeStruct((n_graphs, 1, N_CLASSES), jnp.float32),
        grid=(n_graphs,),
        in_specs=[
            pl.BlockSpec((npg, N_FEATURES), lambda g: (g, 0)),        # x, per-graph rows
            pl.BlockSpec((1, npg, npg), lambda g: (g, 0, 0)),         # adjacency bias
            pl.BlockSpec((1, 2, npg), lambda g: (g, 0, 0)),           # pooling selectors
            full(), full(),            # w0, b0
            full(), full(),            # wcat, bias (stacked over layers)
            full(), full(), full(),    # wf_a, wf_b, bf
        ],
        out_specs=pl.BlockSpec((1, 1, N_CLASSES), lambda g: (g, 0, 0)),
        compiler_params=pltpu.CompilerParams(
            dimension_semantics=("parallel",)),      # graphs are independent -> megacore
    )(x, adj_bias, sel,
      params["w0"], params["b0"],
      params["wcat"], params["bias"],
      params["wf_a"], params["wf_b"], params["bf"])
    return out[:, 0, :]


# --------------------------- parameter init ------------------------------------
def init_params(key):
    keys = jax.random.split(key, 2 + 3 * N_LAYERS)

    # start layer, lane-padded to HPAD with zero columns
    w0 = (jax.random.normal(keys[0], (N_FEATURES, HIDDEN), jnp.float32)
          * (float(N_FEATURES) ** -0.5))
    w0 = jnp.pad(w0, ((0, 0), (0, HPAD - HIDDEN)))
    b0 = jnp.zeros((1, HPAD), jnp.float32)

    # head-indicator: seg[c, h] = 1 iff hidden column c belongs to head h
    col = jnp.arange(HIDDEN) // HEAD_DIM
    seg = (col[:, None] == jnp.arange(HEADS)[None, :]).astype(jnp.float32)   # (HIDDEN, HEADS)

    wcat, bias = [], []
    for l in range(N_LAYERS):
        kw, ks, kd = keys[2 + 3 * l: 2 + 3 * (l + 1)]
        w = (jax.random.normal(kw, (HIDDEN, HEADS * HEAD_DIM), jnp.float32)
             * (float(HIDDEN) ** -0.5))
        att_src = (jax.random.normal(ks, (HEADS, HEAD_DIM), jnp.float32)
                   * (float(HEAD_DIM) ** -0.5))
        att_dst = (jax.random.normal(kd, (HEADS, HEAD_DIM), jnp.float32)
                   * (float(HEAD_DIM) ** -0.5))
        # Fold attention vectors through W on the host:
        #   a_dst = (x @ W) @ (att_dst_flat[:,None] * seg) = x @ (W @ Adst)
        adst_mat = att_dst.reshape(-1)[:, None] * seg                 # (HIDDEN, HEADS)
        asrc_mat = att_src.reshape(-1)[:, None] * seg
        wc = jnp.concatenate([w, w @ adst_mat, w @ asrc_mat], axis=1)  # (HIDDEN, 60)
        wc = jnp.pad(wc, ((0, HPAD - HIDDEN), (0, 0)))                 # (HPAD, 60)
        wcat.append(wc)
        bias.append(jnp.zeros((HPAD,), jnp.float32))

    wf = (jax.random.normal(keys[1], (2 * HIDDEN, N_CLASSES), jnp.float32)
          * (float(2 * HIDDEN) ** -0.5))
    wf_a = jnp.pad(wf[:HIDDEN], ((0, HPAD - HIDDEN), (0, 0)))          # (HPAD, 3)
    wf_b = jnp.pad(wf[HIDDEN:], ((0, HPAD - HIDDEN), (0, 0)))

    return {
        "w0": w0, "b0": b0,
        "wcat": jnp.stack(wcat),       # (L, HPAD, WCAT_COLS)
        "bias": jnp.stack(bias),       # (L, HPAD)
        "wf_a": wf_a, "wf_b": wf_b,
        "bf": jnp.zeros((1, N_CLASSES), jnp.float32),
    }


# --------------------------------- main -----------------------------------------
if __name__ == "__main__":
    NPG = 8                       # nodes per graph (ptr = [0, 8, 16])
    N_GRAPHS = 2
    N_NODES = NPG * N_GRAPHS
    EDGES_PER_GRAPH = 20

    key = jax.random.PRNGKey(0)
    ks = jax.random.split(key, 6)
    x = jax.random.normal(ks[0], (N_NODES, N_FEATURES), jnp.float32)

    # Edges are graph-local (standard PyG batching: edge_index never crosses ptr
    # boundaries) -- this is what makes the per-graph parallel grid exact.
    src_local = jax.random.randint(ks[1], (N_GRAPHS, EDGES_PER_GRAPH), 0, NPG)
    dst_local = jax.random.randint(ks[2], (N_GRAPHS, EDGES_PER_GRAPH), 0, NPG)
    a_mask = jax.random.bernoulli(ks[3], 0.5, (N_NODES,))
    b_mask = jax.random.bernoulli(ks[4], 0.5, (N_NODES,))

    # Dense per-graph adjacency: adj[g, i, j] = 1 iff edge j -> i in graph g, plus
    # self loops (PyG GATConv remove_self_loops + add_self_loops).  Converted on
    # the host to an additive attention bias so the kernel never re-does the
    # compare/select per layer.
    adj = jnp.zeros((N_GRAPHS, NPG, NPG), jnp.float32)
    g_idx = jnp.repeat(jnp.arange(N_GRAPHS), EDGES_PER_GRAPH)
    adj = adj.at[g_idx, dst_local.reshape(-1), src_local.reshape(-1)].set(1.0)
    adj = jnp.maximum(adj, jnp.eye(NPG, dtype=jnp.float32)[None])
    adj_bias = jnp.where(adj > 0.0, 0.0, NEG_BIG).astype(jnp.float32)
    # TODO(synk): at production N, pass adjacency as int8/bool (4x less HBM DMA,
    # matters most on v5e) and build the bias in-kernel once per tile.

    # Per-graph pooling selectors: sel[g, 0, :] = a_mask, sel[g, 1, :] = b_mask.
    sel = jnp.stack([a_mask.reshape(N_GRAPHS, NPG).astype(jnp.float32),
                     b_mask.reshape(N_GRAPHS, NPG).astype(jnp.float32)], axis=1)

    params = init_params(jax.random.PRNGKey(42))

    out = jax.jit(ed_gnn_forward)(params, x, adj_bias, sel)
    out = jax.block_until_ready(out)

    assert out.shape == (N_GRAPHS, N_CLASSES)
    assert bool(jnp.all(jnp.isfinite(out)))
    # exact-division softmax -> rows sum to 1 within f32 rounding
    assert bool(jnp.all(jnp.abs(jnp.sum(out, axis=1) - 1.0) < 1e-4))
    print("KERNEL_OK")
</pallas_src>

<mosaic_0001>
module attributes {stable_mosaic.version = 11 : i64} {
  func.func @ed_gnn_kernel(%arg0: i32, %arg1: memref<8x64xf32, #tpu.memory_space<vmem>>, %arg2: memref<1x8x8xf32, #tpu.memory_space<vmem>>, %arg3: memref<1x2x8xf32, #tpu.memory_space<vmem>>, %arg4: memref<64x128xf32, #tpu.memory_space<vmem>>, %arg5: memref<1x128xf32, #tpu.memory_space<vmem>>, %arg6: memref<2x128x60xf32, #tpu.memory_space<vmem>>, %arg7: memref<2x128xf32, #tpu.memory_space<vmem>>, %arg8: memref<128x3xf32, #tpu.memory_space<vmem>>, %arg9: memref<128x3xf32, #tpu.memory_space<vmem>>, %arg10: memref<1x3xf32, #tpu.memory_space<vmem>>, %arg11: memref<1x1x3xf32, #tpu.memory_space<vmem>>) attributes {dimension_semantics = [#tpu.dimension_semantics<parallel>], iteration_bounds = array<i64: 2>, scalar_prefetch = 0 : i64, scratch_operands = 0 : i64, tpu.core_type = #tpu.core_type<tc>, window_params = [{transform_indices = @transform_0, window_bounds = array<i64: 8, 64>}, {transform_indices = @transform_1, window_bounds = array<i64: 1, 8, 8>}, {transform_indices = @transform_2, window_bounds = array<i64: 1, 2, 8>}, {pipeline_mode = #tpu.pipeline_mode<synchronous>, transform_indices = @transform_3, window_bounds = array<i64: 64, 128>}, {pipeline_mode = #tpu.pipeline_mode<synchronous>, transform_indices = @transform_4, window_bounds = array<i64: 1, 128>}, {pipeline_mode = #tpu.pipeline_mode<synchronous>, transform_indices = @transform_5, window_bounds = array<i64: 2, 128, 60>}, {pipeline_mode = #tpu.pipeline_mode<synchronous>, transform_indices = @transform_6, window_bounds = array<i64: 2, 128>}, {pipeline_mode = #tpu.pipeline_mode<synchronous>, transform_indices = @transform_7, window_bounds = array<i64: 128, 3>}, {pipeline_mode = #tpu.pipeline_mode<synchronous>, transform_indices = @transform_8, window_bounds = array<i64: 128, 3>}, {pipeline_mode = #tpu.pipeline_mode<synchronous>, transform_indices = @transform_9, window_bounds = array<i64: 1, 3>}, {transform_indices = @transform_10, window_bounds = array<i64: 1, 1, 3>}]} {
    %c0 = arith.constant 0 : index
    %c0_0 = arith.constant 0 : index
    %c0_1 = arith.constant 0 : index
    %0 = vector.load %arg2[%c0, %c0_0, %c0_1] : memref<1x8x8xf32, #tpu.memory_space<vmem>>, vector<1x8x8xf32>
    %1 = vector.shape_cast %0 : vector<1x8x8xf32> to vector<8x8xf32>
    %c0_2 = arith.constant 0 : index
    %c0_3 = arith.constant 0 : index
    %c0_4 = arith.constant 0 : index
    %2 = vector.load %arg3[%c0_2, %c0_3, %c0_4] : memref<1x2x8xf32, #tpu.memory_space<vmem>>, vector<1x2x8xf32>
    %3 = vector.shape_cast %2 : vector<1x2x8xf32> to vector<2x8xf32>
    %c0_5 = arith.constant 0 : index
    %c0_6 = arith.constant 0 : index
    %4 = vector.load %arg1[%c0_5, %c0_6] : memref<8x64xf32, #tpu.memory_space<vmem>>, vector<8x64xf32>
    %c0_7 = arith.constant 0 : index
    %c0_8 = arith.constant 0 : index
    %5 = vector.load %arg4[%c0_7, %c0_8] : memref<64x128xf32, #tpu.memory_space<vmem>>, vector<64x128xf32>
    %cst = arith.constant dense<0.000000e+00> : vector<8x128xf32>
    %6 = tpu.matmul %4, %5, %cst {dimension_numbers = #tpu.dot_dimension_numbers<[1], [0], [0], [1], [0, 0, 1, 1], [], []>} : vector<8x64xf32>, vector<64x128xf32>, vector<8x128xf32> -> vector<8x128xf32>
    %c0_9 = arith.constant 0 : index
    %c0_10 = arith.constant 0 : index
    %7 = vector.load %arg5[%c0_9, %c0_10] : memref<1x128xf32, #tpu.memory_space<vmem>>, vector<1x128xf32>
    %8 = vector.broadcast %7 : vector<1x128xf32> to vector<8x128xf32>
    %9 = arith.addf %6, %8 : vector<8x128xf32>
    %c0_11 = arith.constant 0 : index
    %c0_12 = arith.constant 0 : index
    %c0_13 = arith.constant 0 : index
    %10 = vector.load %arg6[%c0_11, %c0_12, %c0_13] : memref<2x128x60xf32, #tpu.memory_space<vmem>>, vector<1x128x60xf32>
    %11 = vector.shape_cast %10 : vector<1x128x60xf32> to vector<128x60xf32>
    %cst_14 = arith.constant dense<0.000000e+00> : vector<8x60xf32>
    %12 = tpu.matmul %9, %11, %cst_14 {dimension_numbers = #tpu.dot_dimension_numbers<[1], [0], [0], [1], [0, 0, 1, 1], [], []>} : vector<8x128xf32>, vector<128x60xf32>, vector<8x60xf32> -> vector<8x60xf32>
    %13 = vector.extract_strided_slice %12 {offsets = [0, 0], sizes = [8, 48], strides = [1, 1]} : vector<8x60xf32> to vector<8x48xf32>
    %14 = vector.extract_strided_slice %12 {offsets = [0, 48], sizes = [8, 6], strides = [1, 1]} : vector<8x60xf32> to vector<8x6xf32>
    %15 = vector.extract_strided_slice %12 {offsets = [0, 54], sizes = [8, 6], strides = [1, 1]} : vector<8x60xf32> to vector<8x6xf32>
    %16 = tpu.transpose %14, [1, 0] : vector<8x6xf32> -> vector<6x8xf32>
    %17 = vector.shape_cast %16 : vector<6x8xf32> to vector<6x8x1xf32>
    %18 = tpu.transpose %15, [1, 0] : vector<8x6xf32> -> vector<6x8xf32>
    %19 = vector.shape_cast %18 : vector<6x8xf32> to vector<6x1x8xf32>
    %20 = vector.broadcast %17 : vector<6x8x1xf32> to vector<6x8x8xf32>
    %21 = vector.broadcast %19 : vector<6x1x8xf32> to vector<6x8x8xf32>
    %22 = arith.addf %20, %21 : vector<6x8x8xf32>
    %cst_15 = arith.constant 2.000000e-01 : f32
    %23 = vector.broadcast %cst_15 : f32 to vector<6x8x8xf32>
    %24 = arith.mulf %23, %22 : vector<6x8x8xf32>
    %25 = arith.maximumf %22, %24 : vector<6x8x8xf32>
    %26 = vector.shape_cast %1 : vector<8x8xf32> to vector<1x8x8xf32>
    %27 = vector.broadcast %26 : vector<1x8x8xf32> to vector<6x8x8xf32>
    %28 = arith.addf %25, %27 : vector<6x8x8xf32>
    %cst_16 = arith.constant dense<0xFF800000> : vector<6x8xf32>
    %29 = vector.multi_reduction <maximumf>, %28, %cst_16 [2] : vector<6x8x8xf32> to vector<6x8xf32>
    %30 = vector.shape_cast %29 : vector<6x8xf32> to vector<6x8x1xf32>
    %31 = vector.broadcast %30 : vector<6x8x1xf32> to vector<6x8x8xf32>
    %32 = arith.subf %28, %31 : vector<6x8x8xf32>
    %33 = math.exp %32 : vector<6x8x8xf32>
    %cst_17 = arith.constant dense<0.000000e+00> : vector<6x8xf32>
    %34 = vector.multi_reduction <add>, %33, %cst_17 [2] : vector<6x8x8xf32> to vector<6x8xf32>
    %35 = vector.shape_cast %34 : vector<6x8xf32> to vector<6x8x1xf32>
    %36 = vector.broadcast %35 : vector<6x8x1xf32> to vector<6x8x8xf32>
    %37 = arith.divf %33, %36 : vector<6x8x8xf32>
    %38 = arith.truncf %37 : vector<6x8x8xf32> to vector<6x8x8xbf16>
    %39 = arith.truncf %13 : vector<8x48xf32> to vector<8x48xbf16>
    %40 = vector.extract_strided_slice %38 {offsets = [0, 0, 0], sizes = [1, 8, 8], strides = [1, 1, 1]} : vector<6x8x8xbf16> to vector<1x8x8xbf16>
    %41 = vector.shape_cast %40 : vector<1x8x8xbf16> to vector<8x8xbf16>
    %42 = vector.extract_strided_slice %39 {offsets = [0, 0], sizes = [8, 8], strides = [1, 1]} : vector<8x48xbf16> to vector<8x8xbf16>
    %cst_18 = arith.constant dense<0.000000e+00> : vector<8x8xf32>
    %43 = tpu.matmul %41, %42, %cst_18 {dimension_numbers = #tpu.dot_dimension_numbers<[1], [0], [0], [1], [0, 0, 1, 1], [], []>} : vector<8x8xbf16>, vector<8x8xbf16>, vector<8x8xf32> -> vector<8x8xf32>
    %44 = vector.extract_strided_slice %38 {offsets = [1, 0, 0], sizes = [1, 8, 8], strides = [1, 1, 1]} : vector<6x8x8xbf16> to vector<1x8x8xbf16>
    %45 = vector.shape_cast %44 : vector<1x8x8xbf16> to vector<8x8xbf16>
    %46 = vector.extract_strided_slice %39 {offsets = [0, 8], sizes = [8, 8], strides = [1, 1]} : vector<8x48xbf16> to vector<8x8xbf16>
    %cst_19 = arith.constant dense<0.000000e+00> : vector<8x8xf32>
    %47 = tpu.matmul %45, %46, %cst_19 {dimension_numbers = #tpu.dot_dimension_numbers<[1], [0], [0], [1], [0, 0, 1, 1], [], []>} : vector<8x8xbf16>, vector<8x8xbf16>, vector<8x8xf32> -> vector<8x8xf32>
    %48 = vector.extract_strided_slice %38 {offsets = [2, 0, 0], sizes = [1, 8, 8], strides = [1, 1, 1]} : vector<6x8x8xbf16> to vector<1x8x8xbf16>
    %49 = vector.shape_cast %48 : vector<1x8x8xbf16> to vector<8x8xbf16>
    %50 = vector.extract_strided_slice %39 {offsets = [0, 16], sizes = [8, 8], strides = [1, 1]} : vector<8x48xbf16> to vector<8x8xbf16>
    %cst_20 = arith.constant dense<0.000000e+00> : vector<8x8xf32>
    %51 = tpu.matmul %49, %50, %cst_20 {dimension_numbers = #tpu.dot_dimension_numbers<[1], [0], [0], [1], [0, 0, 1, 1], [], []>} : vector<8x8xbf16>, vector<8x8xbf16>, vector<8x8xf32> -> vector<8x8xf32>
    %52 = vector.extract_strided_slice %38 {offsets = [3, 0, 0], sizes = [1, 8, 8], strides = [1, 1, 1]} : vector<6x8x8xbf16> to vector<1x8x8xbf16>
    %53 = vector.shape_cast %52 : vector<1x8x8xbf16> to vector<8x8xbf16>
    %54 = vector.extract_strided_slice %39 {offsets = [0, 24], sizes = [8, 8], strides = [1, 1]} : vector<8x48xbf16> to vector<8x8xbf16>
    %cst_21 = arith.constant dense<0.000000e+00> : vector<8x8xf32>
    %55 = tpu.matmul %53, %54, %cst_21 {dimension_numbers = #tpu.dot_dimension_numbers<[1], [0], [0], [1], [0, 0, 1, 1], [], []>} : vector<8x8xbf16>, vector<8x8xbf16>, vector<8x8xf32> -> vector<8x8xf32>
    %56 = vector.extract_strided_slice %38 {offsets = [4, 0, 0], sizes = [1, 8, 8], strides = [1, 1, 1]} : vector<6x8x8xbf16> to vector<1x8x8xbf16>
    %57 = vector.shape_cast %56 : vector<1x8x8xbf16> to vector<8x8xbf16>
    %58 = vector.extract_strided_slice %39 {offsets = [0, 32], sizes = [8, 8], strides = [1, 1]} : vector<8x48xbf16> to vector<8x8xbf16>
    %cst_22 = arith.constant dense<0.000000e+00> : vector<8x8xf32>
    %59 = tpu.matmul %57, %58, %cst_22 {dimension_numbers = #tpu.dot_dimension_numbers<[1], [0], [0], [1], [0, 0, 1, 1], [], []>} : vector<8x8xbf16>, vector<8x8xbf16>, vector<8x8xf32> -> vector<8x8xf32>
    %60 = vector.extract_strided_slice %38 {offsets = [5, 0, 0], sizes = [1, 8, 8], strides = [1, 1, 1]} : vector<6x8x8xbf16> to vector<1x8x8xbf16>
    %61 = vector.shape_cast %60 : vector<1x8x8xbf16> to vector<8x8xbf16>
    %62 = vector.extract_strided_slice %39 {offsets = [0, 40], sizes = [8, 8], strides = [1, 1]} : vector<8x48xbf16> to vector<8x8xbf16>
    %cst_23 = arith.constant dense<0.000000e+00> : vector<8x8xf32>
    %63 = tpu.matmul %61, %62, %cst_23 {dimension_numbers = #tpu.dot_dimension_numbers<[1], [0], [0], [1], [0, 0, 1, 1], [], []>} : vector<8x8xbf16>, vector<8x8xbf16>, vector<8x8xf32> -> vector<8x8xf32>
    %cst_24 = arith.constant 0.000000e+00 : f32
    %64 = vector.broadcast %cst_24 : f32 to vector<8x80xf32>
    %65 = tpu.concatenate %43, %47, %51, %55, %59, %63, %64 in 1 : vector<8x8xf32>, vector<8x8xf32>, vector<8x8xf32>, vector<8x8xf32>, vector<8x8xf32>, vector<8x8xf32>, vector<8x80xf32> -> vector<8x128xf32>
    %c0_25 = arith.constant 0 : index
    %c0_26 = arith.constant 0 : index
    %66 = vector.load %arg7[%c0_25, %c0_26] : memref<2x128xf32, #tpu.memory_space<vmem>>, vector<1x128xf32>
    %67 = vector.broadcast %66 : vector<1x128xf32> to vector<8x128xf32>
    %68 = arith.addf %65, %67 : vector<8x128xf32>
    %cst_27 = arith.constant 0.000000e+00 : f32
    %69 = vector.broadcast %cst_27 : f32 to vector<8x128xf32>
    %70 = arith.cmpf ogt, %68, %69 : vector<8x128xf32>
    %cst_28 = arith.constant 0.000000e+00 : f32
    %71 = vector.broadcast %cst_28 : f32 to vector<8x128xf32>
    %72 = arith.minimumf %68, %71 : vector<8x128xf32>
    %73 = math.exp %72 : vector<8x128xf32>
    %cst_29 = arith.constant 1.000000e+00 : f32
    %74 = vector.broadcast %cst_29 : f32 to vector<8x128xf32>
    %75 = arith.subf %73, %74 : vector<8x128xf32>
    %76 = arith.select %70, %68, %75 : vector<8x128xi1>, vector<8x128xf32>
    %c1 = arith.constant 1 : index
    %c0_30 = arith.constant 0 : index
    %c0_31 = arith.constant 0 : index
    %77 = vector.load %arg6[%c1, %c0_30, %c0_31] : memref<2x128x60xf32, #tpu.memory_space<vmem>>, vector<1x128x60xf32>
    %78 = vector.shape_cast %77 : vector<1x128x60xf32> to vector<128x60xf32>
    %cst_32 = arith.constant dense<0.000000e+00> : vector<8x60xf32>
    %79 = tpu.matmul %76, %78, %cst_32 {dimension_numbers = #tpu.dot_dimension_numbers<[1], [0], [0], [1], [0, 0, 1, 1], [], []>} : vector<8x128xf32>, vector<128x60xf32>, vector<8x60xf32> -> vector<8x60xf32>
    %80 = vector.extract_strided_slice %79 {offsets = [0, 0], sizes = [8, 48], strides = [1, 1]} : vector<8x60xf32> to vector<8x48xf32>
    %81 = vector.extract_strided_slice %79 {offsets = [0, 48], sizes = [8, 6], strides = [1, 1]} : vector<8x60xf32> to vector<8x6xf32>
    %82 = vector.extract_strided_slice %79 {offsets = [0, 54], sizes = [8, 6], strides = [1, 1]} : vector<8x60xf32> to vector<8x6xf32>
    %83 = tpu.transpose %81, [1, 0] : vector<8x6xf32> -> vector<6x8xf32>
    %84 = vector.shape_cast %83 : vector<6x8xf32> to vector<6x8x1xf32>
    %85 = tpu.transpose %82, [1, 0] : vector<8x6xf32> -> vector<6x8xf32>
    %86 = vector.shape_cast %85 : vector<6x8xf32> to vector<6x1x8xf32>
    %87 = vector.broadcast %84 : vector<6x8x1xf32> to vector<6x8x8xf32>
    %88 = vector.broadcast %86 : vector<6x1x8xf32> to vector<6x8x8xf32>
    %89 = arith.addf %87, %88 : vector<6x8x8xf32>
    %cst_33 = arith.constant 2.000000e-01 : f32
    %90 = vector.broadcast %cst_33 : f32 to vector<6x8x8xf32>
    %91 = arith.mulf %90, %89 : vector<6x8x8xf32>
    %92 = arith.maximumf %89, %91 : vector<6x8x8xf32>
    %93 = vector.shape_cast %1 : vector<8x8xf32> to vector<1x8x8xf32>
    %94 = vector.broadcast %93 : vector<1x8x8xf32> to vector<6x8x8xf32>
    %95 = arith.addf %92, %94 : vector<6x8x8xf32>
    %cst_34 = arith.constant dense<0xFF800000> : vector<6x8xf32>
    %96 = vector.multi_reduction <maximumf>, %95, %cst_34 [2] : vector<6x8x8xf32> to vector<6x8xf32>
    %97 = vector.shape_cast %96 : vector<6x8xf32> to vector<6x8x1xf32>
    %98 = vector.broadcast %97 : vector<6x8x1xf32> to vector<6x8x8xf32>
    %99 = arith.subf %95, %98 : vector<6x8x8xf32>
    %100 = math.exp %99 : vector<6x8x8xf32>
    %cst_35 = arith.constant dense<0.000000e+00> : vector<6x8xf32>
    %101 = vector.multi_reduction <add>, %100, %cst_35 [2] : vector<6x8x8xf32> to vector<6x8xf32>
    %102 = vector.shape_cast %101 : vector<6x8xf32> to vector<6x8x1xf32>
    %103 = vector.broadcast %102 : vector<6x8x1xf32> to vector<6x8x8xf32>
    %104 = arith.divf %100, %103 : vector<6x8x8xf32>
    %105 = arith.truncf %104 : vector<6x8x8xf32> to vector<6x8x8xbf16>
    %106 = arith.truncf %80 : vector<8x48xf32> to vector<8x48xbf16>
    %107 = vector.extract_strided_slice %105 {offsets = [0, 0, 0], sizes = [1, 8, 8], strides = [1, 1, 1]} : vector<6x8x8xbf16> to vector<1x8x8xbf16>
    %108 = vector.shape_cast %107 : vector<1x8x8xbf16> to vector<8x8xbf16>
    %109 = vector.extract_strided_slice %106 {offsets = [0, 0], sizes = [8, 8], strides = [1, 1]} : vector<8x48xbf16> to vector<8x8xbf16>
    %cst_36 = arith.constant dense<0.000000e+00> : vector<8x8xf32>
    %110 = tpu.matmul %108, %109, %cst_36 {dimension_numbers = #tpu.dot_dimension_numbers<[1], [0], [0], [1], [0, 0, 1, 1], [], []>} : vector<8x8xbf16>, vector<8x8xbf16>, vector<8x8xf32> -> vector<8x8xf32>
    %111 = vector.extract_strided_slice %105 {offsets = [1, 0, 0], sizes = [1, 8, 8], strides = [1, 1, 1]} : vector<6x8x8xbf16> to vector<1x8x8xbf16>
    %112 = vector.shape_cast %111 : vector<1x8x8xbf16> to vector<8x8xbf16>
    %113 = vector.extract_strided_slice %106 {offsets = [0, 8], sizes = [8, 8], strides = [1, 1]} : vector<8x48xbf16> to vector<8x8xbf16>
    %cst_37 = arith.constant dense<0.000000e+00> : vector<8x8xf32>
    %114 = tpu.matmul %112, %113, %cst_37 {dimension_numbers = #tpu.dot_dimension_numbers<[1], [0], [0], [1], [0, 0, 1, 1], [], []>} : vector<8x8xbf16>, vector<8x8xbf16>, vector<8x8xf32> -> vector<8x8xf32>
    %115 = vector.extract_strided_slice %105 {offsets = [2, 0, 0], sizes = [1, 8, 8], strides = [1, 1, 1]} : vector<6x8x8xbf16> to vector<1x8x8xbf16>
    %116 = vector.shape_cast %115 : vector<1x8x8xbf16> to vector<8x8xbf16>
    %117 = vector.extract_strided_slice %106 {offsets = [0, 16], sizes = [8, 8], strides = [1, 1]} : vector<8x48xbf16> to vector<8x8xbf16>
    %cst_38 = arith.constant dense<0.000000e+00> : vector<8x8xf32>
    %118 = tpu.matmul %116, %117, %cst_38 {dimension_numbers = #tpu.dot_dimension_numbers<[1], [0], [0], [1], [0, 0, 1, 1], [], []>} : vector<8x8xbf16>, vector<8x8xbf16>, vector<8x8xf32> -> vector<8x8xf32>
    %119 = vector.extract_strided_slice %105 {offsets = [3, 0, 0], sizes = [1, 8, 8], strides = [1, 1, 1]} : vector<6x8x8xbf16> to vector<1x8x8xbf16>
    %120 = vector.shape_cast %119 : vector<1x8x8xbf16> to vector<8x8xbf16>
    %121 = vector.extract_strided_slice %106 {offsets = [0, 24], sizes = [8, 8], strides = [1, 1]} : vector<8x48xbf16> to vector<8x8xbf16>
    %cst_39 = arith.constant dense<0.000000e+00> : vector<8x8xf32>
    %122 = tpu.matmul %120, %121, %cst_39 {dimension_numbers = #tpu.dot_dimension_numbers<[1], [0], [0], [1], [0, 0, 1, 1], [], []>} : vector<8x8xbf16>, vector<8x8xbf16>, vector<8x8xf32> -> vector<8x8xf32>
    %123 = vector.extract_strided_slice %105 {offsets = [4, 0, 0], sizes = [1, 8, 8], strides = [1, 1, 1]} : vector<6x8x8xbf16> to vector<1x8x8xbf16>
    %124 = vector.shape_cast %123 : vector<1x8x8xbf16> to vector<8x8xbf16>
    %125 = vector.extract_strided_slice %106 {offsets = [0, 32], sizes = [8, 8], strides = [1, 1]} : vector<8x48xbf16> to vector<8x8xbf16>
    %cst_40 = arith.constant dense<0.000000e+00> : vector<8x8xf32>
    %126 = tpu.matmul %124, %125, %cst_40 {dimension_numbers = #tpu.dot_dimension_numbers<[1], [0], [0], [1], [0, 0, 1, 1], [], []>} : vector<8x8xbf16>, vector<8x8xbf16>, vector<8x8xf32> -> vector<8x8xf32>
    %127 = vector.extract_strided_slice %105 {offsets = [5, 0, 0], sizes = [1, 8, 8], strides = [1, 1, 1]} : vector<6x8x8xbf16> to vector<1x8x8xbf16>
    %128 = vector.shape_cast %127 : vector<1x8x8xbf16> to vector<8x8xbf16>
    %129 = vector.extract_strided_slice %106 {offsets = [0, 40], sizes = [8, 8], strides = [1, 1]} : vector<8x48xbf16> to vector<8x8xbf16>
    %cst_41 = arith.constant dense<0.000000e+00> : vector<8x8xf32>
    %130 = tpu.matmul %128, %129, %cst_41 {dimension_numbers = #tpu.dot_dimension_numbers<[1], [0], [0], [1], [0, 0, 1, 1], [], []>} : vector<8x8xbf16>, vector<8x8xbf16>, vector<8x8xf32> -> vector<8x8xf32>
    %cst_42 = arith.constant 0.000000e+00 : f32
    %131 = vector.broadcast %cst_42 : f32 to vector<8x80xf32>
    %132 = tpu.concatenate %110, %114, %118, %122, %126, %130, %131 in 1 : vector<8x8xf32>, vector<8x8xf32>, vector<8x8xf32>, vector<8x8xf32>, vector<8x8xf32>, vector<8x8xf32>, vector<8x80xf32> -> vector<8x128xf32>
    %c1_43 = arith.constant 1 : index
    %c0_44 = arith.constant 0 : index
    %133 = vector.load %arg7[%c1_43, %c0_44] : memref<2x128xf32, #tpu.memory_space<vmem>>, vector<1x128xf32>
    %134 = vector.broadcast %133 : vector<1x128xf32> to vector<8x128xf32>
    %135 = arith.addf %132, %134 : vector<8x128xf32>
    %cst_45 = arith.constant 0.000000e+00 : f32
    %136 = vector.broadcast %cst_45 : f32 to vector<8x128xf32>
    %137 = arith.cmpf ogt, %135, %136 : vector<8x128xf32>
    %cst_46 = arith.constant 0.000000e+00 : f32
    %138 = vector.broadcast %cst_46 : f32 to vector<8x128xf32>
    %139 = arith.minimumf %135, %138 : vector<8x128xf32>
    %140 = math.exp %139 : vector<8x128xf32>
    %cst_47 = arith.constant 1.000000e+00 : f32
    %141 = vector.broadcast %cst_47 : f32 to vector<8x128xf32>
    %142 = arith.subf %140, %141 : vector<8x128xf32>
    %143 = arith.select %137, %135, %142 : vector<8x128xi1>, vector<8x128xf32>
    %cst_48 = arith.constant dense<0.000000e+00> : vector<2x128xf32>
    %144 = tpu.matmul %3, %143, %cst_48 {dimension_numbers = #tpu.dot_dimension_numbers<[1], [0], [0], [1], [0, 0, 1, 1], [], []>} : vector<2x8xf32>, vector<8x128xf32>, vector<2x128xf32> -> vector<2x128xf32>
    %cst_49 = arith.constant dense<0.000000e+00> : vector<2xf32>
    %145 = vector.multi_reduction <add>, %3, %cst_49 [1] : vector<2x8xf32> to vector<2xf32>
    %146 = vector.shape_cast %145 : vector<2xf32> to vector<2x1xf32>
    %cst_50 = arith.constant 0.000000e+00 : f32
    %147 = vector.broadcast %cst_50 : f32 to vector<2x1xf32>
    %148 = arith.cmpf ogt, %146, %147 : vector<2x1xf32>
    %cst_51 = arith.constant 1.000000e+00 : f32
    %149 = vector.broadcast %cst_51 : f32 to vector<2x1xf32>
    %150 = arith.maximumf %146, %149 : vector<2x1xf32>
    %151 = vector.broadcast %150 : vector<2x1xf32> to vector<2x128xf32>
    %152 = arith.divf %144, %151 : vector<2x128xf32>
    %cst_52 = arith.constant 0.000000e+00 : f32
    %153 = vector.shape_cast %148 : vector<2x1xi1> to vector<2x1xi1>
    %154 = vector.broadcast %153 : vector<2x1xi1> to vector<2x128xi1>
    %155 = vector.broadcast %cst_52 : f32 to vector<2x128xf32>
    %156 = arith.select %154, %152, %155 : vector<2x128xi1>, vector<2x128xf32>
    %157 = vector.extract_strided_slice %156 {offsets = [0, 0], sizes = [1, 128], strides = [1, 1]} : vector<2x128xf32> to vector<1x128xf32>
    %c0_53 = arith.constant 0 : index
    %c0_54 = arith.constant 0 : index
    %158 = vector.load %arg8[%c0_53, %c0_54] : memref<128x3xf32, #tpu.memory_space<vmem>>, vector<128x3xf32>
    %cst_55 = arith.constant dense<0.000000e+00> : vector<1x3xf32>
    %159 = tpu.matmul %157, %158, %cst_55 {dimension_numbers = #tpu.dot_dimension_numbers<[1], [0], [0], [1], [0, 0, 1, 1], [], []>} : vector<1x128xf32>, vector<128x3xf32>, vector<1x3xf32> -> vector<1x3xf32>
    %160 = vector.extract_strided_slice %156 {offsets = [1, 0], sizes = [1, 128], strides = [1, 1]} : vector<2x128xf32> to vector<1x128xf32>
    %c0_56 = arith.constant 0 : index
    %c0_57 = arith.constant 0 : index
    %161 = vector.load %arg9[%c0_56, %c0_57] : memref<128x3xf32, #tpu.memory_space<vmem>>, vector<128x3xf32>
    %cst_58 = arith.constant dense<0.000000e+00> : vector<1x3xf32>
    %162 = tpu.matmul %160, %161, %cst_58 {dimension_numbers = #tpu.dot_dimension_numbers<[1], [0], [0], [1], [0, 0, 1, 1], [], []>} : vector<1x128xf32>, vector<128x3xf32>, vector<1x3xf32> -> vector<1x3xf32>
    %163 = arith.addf %159, %162 : vector<1x3xf32>
    %c0_59 = arith.constant 0 : index
    %c0_60 = arith.constant 0 : index
    %164 = vector.load %arg10[%c0_59, %c0_60] : memref<1x3xf32, #tpu.memory_space<vmem>>, vector<1x3xf32>
    %165 = arith.addf %163, %164 : vector<1x3xf32>
    %cst_61 = arith.constant dense<0xFF800000> : vector<1xf32>
    %166 = vector.multi_reduction <maximumf>, %165, %cst_61 [1] : vector<1x3xf32> to vector<1xf32>
    %167 = vector.shape_cast %166 : vector<1xf32> to vector<1x1xf32>
    %168 = vector.broadcast %167 : vector<1x1xf32> to vector<1x3xf32>
    %169 = arith.subf %165, %168 : vector<1x3xf32>
    %170 = math.exp %169 : vector<1x3xf32>
    %cst_62 = arith.constant dense<0.000000e+00> : vector<1xf32>
    %171 = vector.multi_reduction <add>, %170, %cst_62 [1] : vector<1x3xf32> to vector<1xf32>
    %172 = vector.shape_cast %171 : vector<1xf32> to vector<1x1xf32>
    %173 = vector.broadcast %172 : vector<1x1xf32> to vector<1x3xf32>
    %174 = arith.divf %170, %173 : vector<1x3xf32>
    %c0_63 = arith.constant 0 : index
    %c0_64 = arith.constant 0 : index
    %c0_65 = arith.constant 0 : index
    %175 = vector.load %arg11[%c0_63, %c0_64, %c0_65] : memref<1x1x3xf32, #tpu.memory_space<vmem>>, vector<1x1x3xf32>
    %176 = vector.shape_cast %175 : vector<1x1x3xf32> to vector<1x3xf32>
    %177 = vector.shape_cast %174 : vector<1x3xf32> to vector<1x1x3xf32>
    tpu.vector_store %arg11[%c0_63, %c0_64, %c0_65], %177 {strides = array<i32>} : memref<1x1x3xf32, #tpu.memory_space<vmem>>, vector<1x1x3xf32>,
    return
  }
  func.func @transform_0(%arg0: i32) -> (i32, i32) {
    %c0_i32 = arith.constant 0 : i32
    %c0_i32_0 = arith.constant 0 : i32
    return %arg0, %c0_i32 : i32, i32
  }
  func.func @transform_1(%arg0: i32) -> (i32, i32, i32) {
    %c0_i32 = arith.constant 0 : i32
    %c0_i32_0 = arith.constant 0 : i32
    %c0_i32_1 = arith.constant 0 : i32
    return %arg0, %c0_i32, %c0_i32_0 : i32, i32, i32
  }
  func.func @transform_2(%arg0: i32) -> (i32, i32, i32) {
    %c0_i32 = arith.constant 0 : i32
    %c0_i32_0 = arith.constant 0 : i32
    %c0_i32_1 = arith.constant 0 : i32
    return %arg0, %c0_i32, %c0_i32_0 : i32, i32, i32
  }
  func.func @transform_3(%arg0: i32) -> (i32, i32) {
    %c0_i32 = arith.constant 0 : i32
    %c0_i32_0 = arith.constant 0 : i32
    %c0_i32_1 = arith.constant 0 : i32
    return %c0_i32, %c0_i32_0 : i32, i32
  }
  func.func @transform_4(%arg0: i32) -> (i32, i32) {
    %c0_i32 = arith.constant 0 : i32
    %c0_i32_0 = arith.constant 0 : i32
    %c0_i32_1 = arith.constant 0 : i32
    return %c0_i32, %c0_i32_0 : i32, i32
  }
  func.func @transform_5(%arg0: i32) -> (i32, i32, i32) {
    %c0_i32 = arith.constant 0 : i32
    %c0_i32_0 = arith.constant 0 : i32
    %c0_i32_1 = arith.constant 0 : i32
    %c0_i32_2 = arith.constant 0 : i32
    return %c0_i32, %c0_i32_0, %c0_i32_1 : i32, i32, i32
  }
  func.func @transform_6(%arg0: i32) -> (i32, i32) {
    %c0_i32 = arith.constant 0 : i32
    %c0_i32_0 = arith.constant 0 : i32
    %c0_i32_1 = arith.constant 0 : i32
    return %c0_i32, %c0_i32_0 : i32, i32
  }
  func.func @transform_7(%arg0: i32) -> (i32, i32) {
    %c0_i32 = arith.constant 0 : i32
    %c0_i32_0 = arith.constant 0 : i32
    %c0_i32_1 = arith.constant 0 : i32
    return %c0_i32, %c0_i32_0 : i32, i32
  }
  func.func @transform_8(%arg0: i32) -> (i32, i32) {
    %c0_i32 = arith.constant 0 : i32
    %c0_i32_0 = arith.constant 0 : i32
    %c0_i32_1 = arith.constant 0 : i32
    return %c0_i32, %c0_i32_0 : i32, i32
  }
  func.func @transform_9(%arg0: i32) -> (i32, i32) {
    %c0_i32 = arith.constant 0 : i32
    %c0_i32_0 = arith.constant 0 : i32
    %c0_i32_1 = arith.constant 0 : i32
    return %c0_i32, %c0_i32_0 : i32, i32
  }
  func.func @transform_10(%arg0: i32) -> (i32, i32, i32) {
    %c0_i32 = arith.constant 0 : i32
    %c0_i32_0 = arith.constant 0 : i32
    %c0_i32_1 = arith.constant 0 : i32
    return %arg0, %c0_i32, %c0_i32_0 : i32, i32, i32
  }
}

</mosaic_0001>

<bundles_post_ra>
// kernel: ed_gnn_forward.1
= control target key start
LH: loop header
LB: loop body
LE: loop exit
PB: predicated region body
PF: predicated region fallthrough
CT: control target
= control target key end

     0   :  { %s3530_s0 = inlined_call_operand.vmem [shape: f32[16,64], index: 0, kind: input, shape index: {}]   ;;  %s3531_s1 = inlined_call_operand.vmem [shape: f32[2,8,8], index: 1, kind: input, shape index: {}]   ;;  %s3532_s2 = inlined_call_operand.vmem [shape: f32[2,2,8], index: 2, kind: input, shape index: {}]   ;;  %s3533_s3 = inlined_call_operand.vmem [shape: f32[64,128], index: 3, kind: input, shape index: {}]   ;;  %s3534_s4 = inlined_call_operand.vmem [shape: f32[1,128], index: 4, kind: input, shape index: {}]   ;;  %s3535_s5 = inlined_call_operand.vmem [shape: f32[2,128,60], index: 5, kind: input, shape index: {}]   ;;  %s3536_s6 = inlined_call_operand.vmem [shape: f32[2,128], index: 6, kind: input, shape index: {}]   ;;  %s3537_s7 = inlined_call_operand.vmem [shape: f32[128,3], index: 7, kind: input, shape index: {}]   ;;  %s3538_s8 = inlined_call_operand.vmem [shape: f32[128,3], index: 8, kind: input, shape index: {}]   ;;  %s3539_s9 = inlined_call_operand.vmem [shape: f32[1,3], index: 9, kind: input, shape index: {}]   ;;  %s3540_s10 = inlined_call_operand.hbm [shape: f32[2,1,3], index: 10, kind: output, shape index: {}]  }
   0x1   :  { %3549 = sst [smem:[#allocation5_spill]] %s3530_s0 }
   0x2   :  { %15 = vsyncpa [#allocation3], 0 }
   0x3   :  { %17 = vsyncpa [#allocation3 + $0x1], 0  ;;  %s2883_s13 = smov 0   ;;  %s2885_s14 = smov 0  }
   0x4   :  { %s2887_s15 = smov 0   ;;  %s2889_s16 = smov 0  }
   0x5 LB: > { %s2904_s17 = sadd.s32 4294967295, %s2810_s16   ;;  %s2253_s18 = sadd.s32 4294967294, %s2810_s16   ;;  %s2810_s16 = sphi %s2889_s16, %s3564_s16   ;;  %s2806_s15 = sphi %s2887_s15, %s3563_s15   ;;  %s2802_s14 = sphi %s2885_s14, %s3562_s14   ;;  %s2798_s13 = sphi %s2883_s13, %s3561_s13  }
   0x6   : > { %s2908_s19 = sadd.s32 1, %s2810_s16   ;;  %s255_s20 = sadd.s32 1, %s2806_s15 }
   0x7   : > { %s252_s21 = ssub.s32 %s2810_s16, %s2908_s19  ;;  %p265_p0 = scmp.ne.s32.totalorder %s2806_s15, %s2802_s14 }
   0x8   : > { %p253_p1 = scmp.eq.s32.totalorder %s252_s21, 0  ;;  %p266_p2 = scmp.eq.s32.totalorder %s2904_s17, 1 }
   0x9   : > { %p271_p3 = scmp.ne.s32.totalorder %s2802_s14, %s2798_s13  ;;  %p272_p4 = scmp.eq.s32.totalorder %s2253_s18, 1 }
   0xa   : > { %s2919_s22 = scalar_select %p253_p1, %s2806_s15, %s255_s20  }
   0xb   : > { %p2921_p5 = por %p266_p2, %p265_p0  ;;  %p2925_p6 = por %p272_p4, %p271_p3 }
   0xc   : > { %p2256_p7 = scmp.ge.s32.totalorder %s2810_s16, 1  ;;  %p332_p8 = scmp.lt.s32.totalorder %s2810_s16, 3 }
   0xe   : > { %p333_p9 = pnand %p2256_p7, %p332_p8 }
   0xf   : > { %p376_p10 = scmp.lt.s32.totalorder (!%p333_p9), %s2904_s17, 1  ;;  %s3552_s0 = sld [smem:[#allocation5_spill]] (!%p333_p9) }
  0x10   : > { %336 = sbr.rel (%p333_p9) target bundleno = 3609 (0xe19), region = 60  ;;  %s2814_s12 = smov (!%p333_p9), 80  }
  0x11   : > { %s2815_s20 = smov (!%p333_p9), 74   ;;  %s3544_s28 = smov (!%p333_p9), 104  }
  0x12   : > { %s3543_s29 = smov (!%p333_p9), 112   ;;  %s3542_s30 = smov (!%p333_p9), 96  }
  0x13   : > { %s3541_s11 = smov (!%p333_p9), 88   ;;  %s3547_s26 = smov (!%p333_p9), 40  }
  0x15   : > { %v399_v0 = vld [vmem:[%s3533_s3 + $0x38] sm:$0xff]  ;;  %v2812_v1 = vmov 0.0   ;;  %v398_v2 = vld [vmem:[%s3533_s3 + $0x30] sm:$0xff]  ;;  %vm2813_vm0 = vmmov 0   ;;  %v397_v4 = vld [vmem:[%s3533_s3 + $0x28] sm:$0xff]  ;;  %s2955_s21 = scalar_select %p376_p10, %s2904_s17, 1  ;;  %v603_v35 = vlaneseq }
  0x16   : > { %2402 = vmatprep.subr.mxu0 %v2812_v1  ;;  %2418 = vmatprep.mubr.msk.f32.mxu0 %vm2813_vm0, %v2812_v1  ;;  %v496_v3 = vld [vmem:[%s3535_s5 + $0x78] sm:$0xff]  ;;  %v495_v5 = vld [vmem:[%s3535_s5 + $0x70] sm:$0xff]  ;;  %v494_v6 = vld [vmem:[%s3535_s5 + $0x68] sm:$0xff]  ;;  %vm407_vm1 = vcmask 523264   ;;  %vm859_vm2 = vcmask 1043456   ;;  %vm782_vm3 = vcmask 64512  }
  0x17   : > { %2403 = vmatpush3.msra.mxu0 %v399_v0  ;;  %2421 = vmatprep.subr.mxu1 %v2812_v1  ;;  %v396_v7 = vld [vmem:[%s3533_s3 + $0x20] sm:$0xff]  ;;  %v395_v9 = vld [vmem:[%s3533_s3 + $0x18] sm:$0xff]  ;;  %s2257_s18 = sshll.u32 %s2955_s21, 3  ;;  %v394_v11 = vld [vmem:[%s3533_s3 + $0x10] sm:$0xff]  ;;  %v3059_v36 = vshrl.u32 %v603_v35, 7  ;;  %vm1165_vm4 = vcmask 130048  }
  0x18   : > { %2404 = vmatprep.subr.mxu0 %v2812_v1  ;;  %2422 = vmatpush3.msra.mxu1 %v496_v3  ;;  %v493_v8 = vld [vmem:[%s3535_s5 + $0x60] sm:$0xff]  ;;  %v492_v10 = vld [vmem:[%s3535_s5 + $0x58] sm:$0xff]  ;;  %v491_v12 = vld [vmem:[%s3535_s5 + $0x50] sm:$0xff]  ;;  %s379_s25 = scalar_lea.vmem %s3552_s0, %s2257_s18  ;;  %v2816_v52 = vmov 1966171168   ;;  %s383_s27 = scalar_lea.vmem %s3531_s1, %s2257_s18  ;;  %vm1167_vm5 = vcmask 195584  }
  0x19   : > { %2405 = vmatpush3.msra.mxu0 %v398_v2  ;;  %2423 = vmatprep.subr.mxu1 %v2812_v1  ;;  %v393_v13 = vld [vmem:[%s3533_s3 + $0x8] sm:$0xff]  ;;  %v392_v15 = vld [vmem:[%s3533_s3] sm:$0xff]  ;;  %v488_v18 = vld [vmem:[%s3535_s5 + $0x38] sm:$0xff]  ;;  %v3062_v37 = vsub.s32 0, %v3059_v36  ;;  %v612_v38 = vsub.s32 1, %v3059_v36  ;;  %v619_v42 = vsub.s32 2, %v3059_v36  ;;  %v683_v53 = vunpack.c.l.s4 %v2816_v52 }
  0x1a   : > { %2406 = vmatprep.subr.mxu0 %v2812_v1  ;;  %2424 = vmatpush3.msra.mxu1 %v495_v5  ;;  %v490_v14 = vld [vmem:[%s3535_s5 + $0x48] sm:$0xff]  ;;  %v391_v16 = vld [vmem:[%s379_s25] sm:$0xff]  ;;  %v487_v19 = vld [vmem:[%s3535_s5 + $0x30] sm:$0xff]  ;;  %v633_v43 = vsub.s32 4, %v3059_v36  ;;  %v626_v46 = vsub.s32 3, %v3059_v36  ;;  %v640_v47 = vsub.s32 5, %v3059_v36 }
  0x1b   : > { %2407 = vmatpush3.msra.mxu0 %v397_v4  ;;  %2425 = vmatprep.subr.mxu1 %v2812_v1  ;;  %v489_v17 = vld [vmem:[%s3535_s5 + $0x40] sm:$0xff]  ;;  %v486_v20 = vld [vmem:[%s3535_s5 + $0x28] sm:$0xff]  ;;  %v484_v22 = vld [vmem:[%s3535_s5 + $0x18] sm:$0xff]  ;;  %v684_v55 = vunpack.c.0.s8 %v683_v53  ;;  %s2817_s18 = smov 120   ;;  %vm1169_vm6 = vcmask 261120   ;;  %vm1171_vm7 = vcmask 326656  }
  0x1c   : > { %2408 = vmatprep.subr.mxu0 %v2812_v1  ;;  %2426 = vmatpush3.msra.mxu1 %v494_v6  ;;  %v485_v21 = vld [vmem:[%s3535_s5 + $0x20] sm:$0xff]  ;;  %v483_v23 = vld [vmem:[%s3535_s5 + $0x10] sm:$0xff]  ;;  %v482_v24 = vld [vmem:[%s3535_s5 + $0x8] sm:$0xff]  ;;  %vm1173_vm8 = vcmask 392192   ;;  %s3556_s25 = smov 88   ;;  %vm1960_vm10 = vcmask 58368  }
  0x1d   : > { %2409 = vmatpush3.msra.mxu0 %v396_v7  ;;  %2427 = vmatprep.subr.mxu1 %v2812_v1  ;;  %v481_v25 = vld [vmem:[%s3535_s5] sm:$0xff]  ;;  %v3081_v57 = vsub.s32 %v684_v55, %v3059_v36  ;;  %vm2148_vm13 = vcmask 16384  }
  0x1e   : > { %2410 = vmatprep.subr.mxu0 %v2812_v1  ;;  %2428 = vmatpush3.msra.mxu1 %v493_v8  ;;  %v2260_v26 = vld [vmem:[%s3534_s4] ss:$0 sm:$0xff] }
  0x1f   : > { %2411 = vmatpush3.msra.mxu0 %v395_v9  ;;  %2429 = vmatprep.subr.mxu1 %v2812_v1 }
  0x20   : > { %2412 = vmatprep.subr.mxu0 %v2812_v1  ;;  %2430 = vmatpush3.msra.mxu1 %v492_v10 }
  0x21   : > { %2413 = vmatpush3.msra.mxu0 %v394_v11  ;;  %2431 = vmatprep.subr.mxu1 %v2812_v1 }
  0x22   : > { %2414 = vmatprep.subr.mxu0 %v2812_v1  ;;  %2432 = vmatpush3.msra.mxu1 %v491_v12 }
  0x23   : > { %2415 = vmatpush3.msra.mxu0 %v393_v13  ;;  %2433 = vmatprep.subr.mxu1 %v2812_v1 }
  0x24   : > { %2416 = vmatprep.subr.mxu0 %v2812_v1  ;;  %2434 = vmatpush3.msra.mxu1 %v490_v14 }
  0x25   : > { %2417 = vmatpush3.msra.mxu0 %v392_v15  ;;  %2435 = vmatprep.subr.mxu1 %v2812_v1 }
  0x26   : > { %2419 = vmatmul.mubr.msk.f32.vlgmr.msra.gmra.mxu0 %vm407_vm1, %v391_v16  ;;  %2436 = vmatpush3.msra.mxu1 %v489_v17 }
  0x27   : > { %2437 = vmatprep.subr.mxu1 %v2812_v1  ;;  %2453 = vmatprep.mubr.msk.f32.mxu1 %vm2813_vm0, %v2812_v1 }
  0x28   : > { %2438 = vmatpush3.msra.mxu1 %v488_v18  ;;  %2456 = vmatprep.subr.bf16.mxu0 %v2812_v1  ;;  %v3099_v18 = vld [vmem:[%s383_s27] sm:$0xff]  ;;  %s3545_s27 = smov 16  }
  0x29   : > { %2439 = vmatprep.subr.mxu1 %v2812_v1  ;;  %2458 = vmatprep.mubr.msk.bf16.mxu0 %vm2813_vm0, %v2812_v1 }
  0x2a   : > { %2440 = vmatpush3.msra.mxu1 %v487_v19 }
  0x2b   : > { %2441 = vmatprep.subr.mxu1 %v2812_v1 }
  0x2c   : > { %2442 = vmatpush3.msra.mxu1 %v486_v20 }
  0x2d   : > { %2443 = vmatprep.subr.mxu1 %v2812_v1 }
  0x2e   : > { %2444 = vmatpush3.msra.mxu1 %v485_v21 }
  0x2f   : > { %2445 = vmatprep.subr.mxu1 %v2812_v1 }
  0x30   : > { %2446 = vmatpush3.msra.mxu1 %v484_v22 }
  0x31   : > { %2447 = vmatprep.subr.mxu1 %v2812_v1 }
  0x32   : > { %2448 = vmatpush3.msra.mxu1 %v483_v23 }
  0x33   : > { %2449 = vmatprep.subr.mxu1 %v2812_v1 }
  0x34   : > { %2450 = vmatpush3.msra.mxu1 %v482_v24 }
  0x35   : > { %2451 = vmatprep.subr.mxu1 %v2812_v1 }
  0x36   : > { %2452 = vmatpush3.msra.mxu1 %v481_v25 }
  0x37   : > { %2474 = vmatprep.subr.bf16.mxu1 %v2812_v1 }
  0xe6   : > { %v477_v27 = vpop.f32.mrf.mxu0 }
  0xe7   : > { %v478_v28 = vadd.f32 %v2260_v26, %v477_v27 }
  0xe8   : > { %v2420_v29 = vpop.f32.mrf.mxu0 }
  0xe9   : > { %2454 = vmatmul.mubr.f32.vlgmr.msra.gmra.mxu1 %v478_v28 }
  0xea   : > { %2476 = vmatprep.mubr.msk.bf16.mxu1 %vm2813_vm0, %v2812_v1 }
 0x1a9   : > { %v563_v30 = vpop.f32.mrf.mxu1 }
 0x1aa   : > { %v3052_v31 = vpack.c.bf16 %v563_v30, %v563_v30  ;;  %568 = vrot.lane.b32.xlu0 %v563_v30, %s2814_s12 }
 0x1ab   : > { %v2455_v32 = vpop.f32.mrf.mxu1 }
 0x1ac   : > { %v861_v33 = vsel %vm859_vm2, %v3052_v31, 0 }
 0x1ad   : > { %2457 = vmatpush3.bf16.msra.mxu0 %v861_v33 }
 0x1ae   : > { %645 = vrot.lane.b32.xlu0 %v563_v30, %s2815_s20  ;;  %2462 = vmatprep.subr.bf16.mxu0 %v2812_v1 }
 0x21c   : > { %v569_v34 = vpop.permute.xlu0 %568 }
 0x21d   : > { %571 = vxpose.xlu1.b32.start.end [1/1] (short) (narrow) %v569_v34, 8 }
 0x220   : > { %v646_v50 = vpop.permute.xlu0 %645 }
 0x299   : > { %v587_v39 = vpop.trf.xlu1 }
 0x29a   : > { %v613_v40 = vrot.slane %v587_v39, %v612_v38  ;;  %v606_v41 = vrot.slane %v587_v39, %v3062_v37  ;;  %v620_v44 = vrot.slane %v587_v39, %v619_v42  ;;  %v634_v45 = vrot.slane %v587_v39, %v633_v43 }
 0x29b   : > { %v627_v48 = vrot.slane %v587_v39, %v626_v46  ;;  %v641_v49 = vrot.slane %v587_v39, %v640_v47 }
 0x29c   : > { %615 = vbcast.lane.b32.xlu0 %v613_v40, 256  ;;  %608 = vbcast.lane.b32.xlu1 %v606_v41, 256 }
 0x2a0   : > { %622 = vbcast.lane.b32.xlu0 %v620_v44, 256  ;;  %636 = vbcast.lane.b32.xlu1 %v634_v45, 256 }
 0x2a4   : > { %629 = vbcast.lane.b32.xlu0 %v627_v48, 256  ;;  %643 = vbcast.lane.b32.xlu1 %v641_v49, 256 }
 0x2c2   : > { %648 = vxpose.xlu0.b32.start.end [1/1] (short) (narrow) %v646_v50, 8 }
 0x30e   : > { %v616_v51 = vpop.permute.xlu0 %615  ;;  %v609_v61 = vpop.permute.xlu1 %608 }
 0x312   : > { %v623_v54 = vpop.permute.xlu0 %622  ;;  %v637_v11 = vpop.permute.xlu1 %636 }
 0x316   : > { %v630_v56 = vpop.permute.xlu0 %629  ;;  %v644_v28 = vpop.permute.xlu1 %643 }
 0x33e   : > { %v664_v58 = vpop.trf.xlu0 }
 0x33f   : > { %v681_v59 = vcombine.high %v664_v58, %v664_v58  ;;  %v688_v60 = vrot.slane %v664_v58, %v3081_v57 }
 0x341   : > { %v695_v62 = vrot.slane %v681_v59, %v3081_v57  ;;  %v696_v63 = vcombine.high %v688_v60, %v688_v60  ;;  %v704_v0 = vrot.slane %v688_v60, %v3081_v57 }
 0x343   : > { %v697_v2 = vcombine.high %v695_v62, %v695_v62  ;;  %v711_v3 = vrot.slane %v695_v62, %v3081_v57  ;;  %v718_v4 = vrot.slane %v696_v63, %v3081_v57  ;;  %v726_v5 = vcombine.high %v704_v0, %v704_v0 }
 0x344   : > { %v731_v6 = vrot.slane %v704_v0, %v3062_v37 }
 0x345   : > { %v725_v7 = vrot.slane %v697_v2, %v3081_v57  ;;  %v727_v8 = vcombine.high %v718_v4, %v718_v4  ;;  %v735_v9 = vrot.slane %v718_v4, %v3062_v37  ;;  %v739_v10 = vrot.slane %v726_v5, %v3062_v37 }
 0x346   : > { %v747_v12 = vrot.slane %v711_v3, %v3062_v37  ;;  %v758_v13 = vadd.f32 %v731_v6, %v609_v61 }
 0x347   : > { %v759_v14 = vadd.f32 %v735_v9, %v616_v51  ;;  %v760_v15 = vadd.f32 %v739_v10, %v623_v54  ;;  %v743_v16 = vrot.slane %v727_v8, %v3062_v37  ;;  %v751_v22 = vrot.slane %v725_v7, %v3062_v37 }
 0x348   : > { %v764_v17 = vmul.f32 0.2, %v758_v13  ;;  %v762_v24 = vadd.f32 %v747_v12, %v637_v11 }
 0x349   : > { %v765_v19 = vmul.f32 0.2, %v759_v14  ;;  %v766_v20 = vmul.f32 0.2, %v760_v15  ;;  %v761_v21 = vadd.f32 %v743_v16, %v630_v56  ;;  %v763_v32 = vadd.f32 %v751_v22, %v644_v28 }
 0x34a   : > { %v770_v23 = vmax.f32 %v758_v13, %v764_v17  ;;  %v768_v39 = vmul.f32 0.2, %v762_v24 }
 0x34b   : > { %v771_v25 = vmax.f32 %v759_v14, %v765_v19  ;;  %v772_v26 = vmax.f32 %v760_v15, %v766_v20  ;;  %v767_v27 = vmul.f32 0.2, %v761_v21  ;;  %v769_v48 = vmul.f32 0.2, %v763_v32 }
 0x34c   : > { %v776_v29 = vadd.f32 %v770_v23, %v3099_v18  ;;  %v774_v45 = vmax.f32 %v762_v24, %v768_v39 }
 0x34d   : > { %v777_v30 = vadd.f32 %v771_v25, %v3099_v18  ;;  %v778_v34 = vadd.f32 %v772_v26, %v3099_v18  ;;  %v773_v35 = vmax.f32 %v761_v21, %v767_v27  ;;  %v775_v51 = vmax.f32 %v763_v32, %v769_v48 }
 0x34e   : > { %v783_v33 = vsel %vm782_vm3, %v776_v29, -inf  ;;  %v780_v50 = vadd.f32 %v774_v45, %v3099_v18 }
 0x34f   : > { %784 = vmax.xlane.f32.xlu1 %v783_v33  ;;  %v786_v40 = vsel %vm782_vm3, %v777_v30, -inf  ;;  %v789_v41 = vsel %vm782_vm3, %v778_v34, -inf  ;;  %v779_v44 = vadd.f32 %v773_v35, %v3099_v18  ;;  %v781_v53 = vadd.f32 %v775_v51, %v3099_v18 }
 0x350   : > { %787 = vmax.xlane.f32.xlu0 %v786_v40  ;;  %v795_v52 = vsel %vm782_vm3, %v780_v50, -inf }
 0x351   : > { %v792_v49 = vsel %vm782_vm3, %v779_v44, -inf  ;;  %v798_v54 = vsel %vm782_vm3, %v781_v53, -inf }
 0x353   : > { %790 = vmax.xlane.f32.xlu1 %v789_v41 }
 0x357   : > { %793 = vmax.xlane.f32.xlu1 %v792_v49 }
 0x35b   : > { %796 = vmax.xlane.f32.xlu1 %v795_v52 }
 0x35f   : > { %799 = vmax.xlane.f32.xlu1 %v798_v54 }
 0x370   : > { %904 = vrot.lane.b32.xlu1 %v3052_v31, %s2817_s18 }
 0x3d8   : > { %v785_v55 = vpop.xlane.xlu1 %784 }
 0x3d9   : > { %v801_v56 = vsub.f32 %v776_v29, %v785_v55  ;;  %v788_v58 = vpop.xlane.xlu0 %787 }
 0x3da   : > { %v802_v59 = vsub.f32 %v777_v30, %v788_v58 }
 0x3db   : > { %v807_v60 = vmul.f32 1.442695, %v801_v56 }
 0x3dc   : > { %v809_v61 = vmul.f32 1.442695, %v802_v59  ;;  %v791_v3 = vpop.xlane.xlu1 %790 }
 0x3dd   : > { %2692 = vpow2.f32 %v807_v60  ;;  %v803_v6 = vsub.f32 %v778_v34, %v791_v3 }
 0x3de   : > { %2694 = vpow2.f32 %v809_v61 }
 0x3df   : > { %v811_v9 = vmul.f32 1.442695, %v803_v6 }
 0x3e0   : > { %v794_v4 = vpop.xlane.xlu1 %793 }
 0x3e1   : > { %v804_v7 = vsub.f32 %v779_v44, %v794_v4  ;;  %2696 = vpow2.f32 %v811_v9 }
 0x3e3   : > { %v813_v11 = vmul.f32 1.442695, %v804_v7 }
 0x3e4   : > { %v797_v5 = vpop.xlane.xlu1 %796 }
 0x3e5   : > { %v805_v10 = vsub.f32 %v780_v50, %v797_v5  ;;  %2698 = vpow2.f32 %v813_v11  ;;  %v2285_v11 = vld [vmem:[%s3535_s5 + $0xf8] sm:$0xff] }
 0x3e7   : > { %v815_v13 = vmul.f32 1.442695, %v805_v10 }
 0x3e8   : > { %v800_v8 = vpop.xlane.xlu1 %799 }
 0x3e9   : > { %v806_v12 = vsub.f32 %v781_v53, %v800_v8  ;;  %2700 = vpow2.f32 %v815_v13  ;;  %v2283_v13 = vld [vmem:[%s3535_s5 + $0xe8] sm:$0xff] }
 0x3ea   : > { %v2693_v62 = vpop.eup %2692 }
 0x3eb   : > { %v2695_v63 = vpop.eup %2694  ;;  %v819_v0 = vsel %vm782_vm3, %v2693_v62, 0.0  ;;  %v817_v14 = vmul.f32 1.442695, %v806_v12  ;;  %v2284_v12 = vld [vmem:[%s3535_s5 + $0xf0] sm:$0xff] }
 0x3ec   : > { %820 = vadd.xlane.f32.xlu1 %v819_v0  ;;  %v822_v2 = vsel %vm782_vm3, %v2695_v63, 0.0  ;;  %v905_v24 = vpop.permute.xlu1 %904 }
 0x3ed   : > { %823 = vadd.xlane.f32.xlu0 %v822_v2  ;;  %2702 = vpow2.f32 %v817_v14  ;;  %v910_v34 = vsel %vm859_vm2, %v905_v24, 0  ;;  %v2282_v14 = vld [vmem:[%s3535_s5 + $0xe0] sm:$0xff] }
 0x3ee   : > { %v2697_v15 = vpop.eup %2696 }
 0x3ef   : > { %v825_v17 = vsel %vm782_vm3, %v2697_v15, 0.0 }
 0x3f2   : > { %v2699_v16 = vpop.eup %2698 }
 0x3f3   : > { %v828_v20 = vsel %vm782_vm3, %v2699_v16, 0.0 }
 0x3f6   : > { %v3123_v19 = vpop.eup %2700 }
 0x3f7   : > { %v831_v22 = vsel %vm782_vm3, %v3123_v19, 0.0 }
 0x3fa   : > { %v3126_v21 = vpop.eup %2702 }
 0x3fb   : > { %v834_v23 = vsel %vm782_vm3, %v3126_v21, 0.0 }
 0x3fd   : > { %1000 = vrot.lane.b32.xlu1 %v3052_v31, %s3544_s28  ;;  %s2259_s28 = sshll.u32 %s2955_s21, 1 }
 0x403   : > { %952 = vrot.lane.b32.xlu0 %v3052_v31, %s3543_s29  ;;  %s3546_s29 = smov 24  }
 0x421   : > { %826 = vadd.xlane.f32.xlu1 %v825_v17 }
 0x422   : > { %829 = vadd.xlane.f32.xlu0 %v828_v20  ;;  %v2280_v20 = vld [vmem:[%s3535_s5 + $0xd0] sm:$0xff] }
 0x425   : > { %832 = vadd.xlane.f32.xlu1 %v831_v22 }
 0x426   : > { %835 = vadd.xlane.f32.xlu0 %v834_v23  ;;  %v2279_v23 = vld [vmem:[%s3535_s5 + $0xc8] sm:$0xff] }
 0x436   : > { %1048 = vrot.lane.b32.xlu1 %v3052_v31, %s3542_s30 }
 0x43c   : > { %1096 = vrot.lane.b32.xlu0 %v3052_v31, %s3541_s11  ;;  %s3557_s11 = smov 16  }
 0x475   : > { %v821_v25 = vpop.xlane.xlu1 %820 }
 0x476   : > { %2704 = vrcp.f32 %v821_v25  ;;  %v824_v26 = vpop.xlane.xlu0 %823  ;;  %v2278_v25 = vld [vmem:[%s3535_s5 + $0xc0] sm:$0xff] }
 0x477   : > { %2706 = vrcp.f32 %v824_v26 }
 0x479   : > { %v1001_v27 = vpop.permute.xlu1 %1000 }
 0x47a   : > { %v1006_v28 = vsel %vm859_vm2, %v1001_v27, 0  ;;  %v953_v35 = vpop.permute.xlu0 %952  ;;  %v2277_v27 = vld [vmem:[%s3535_s5 + $0xb8] sm:$0xff] }
 0x47b   : > { %2475 = vmatpush3.bf16.msra.mxu1 %v1006_v28  ;;  %v958_v40 = vsel %vm859_vm2, %v953_v35, 0 }
 0x47c   : > { %2486 = vmatprep.subr.bf16.mxu1 %v2812_v1 }
 0x483   : > { %v2705_v29 = vpop.eup %2704 }
 0x484   : > { %v838_v30 = vmul.f32 %v2705_v29, %v2693_v62  ;;  %v2707_v33 = vpop.eup %2706 }
 0x485   : > { %v840_v31 = vmul.f32 %v2707_v33, %v2695_v63 }
 0x486   : > { %v849_v32 = vpack.c.bf16 %v838_v30, %v838_v30  ;;  %v2276_v30 = vld [vmem:[%s3535_s5 + $0xb0] sm:$0xff] }
 0x487   : > { %v850_v39 = vpack.c.bf16 %v840_v31, %v840_v31 }
 0x488   : > { %2459 = vmatmul.mubr.msk.bf16.vlgmr.msra.gmra.mxu0 %vm782_vm3, %v849_v32 }
 0x489   : > { %2463 = vmatpush3.bf16.msra.mxu0 %v910_v34  ;;  %2464 = vmatprep.mubr.msk.bf16.mxu0 %vm2813_vm0, %v2812_v1  ;;  %v2275_v34 = vld [vmem:[%s3535_s5 + $0xa8] sm:$0xff] }
 0x48a   : > { %2468 = vmatprep.subr.bf16.mxu0 %v2812_v1 }
 0x490   : > { %2465 = vmatmul.mubr.msk.bf16.vlgmr.msra.gmra.mxu0 %vm782_vm3, %v850_v39  ;;  %v2274_v39 = vld [vmem:[%s3535_s5 + $0xa0] sm:$0xff] }
 0x491   : > { %2469 = vmatpush3.bf16.msra.mxu0 %v958_v40  ;;  %2470 = vmatprep.mubr.msk.bf16.mxu0 %vm2813_vm0, %v2812_v1 }
 0x492   : > { %2480 = vmatprep.subr.bf16.mxu0 %v2812_v1 }
 0x4aa   : > { %v827_v41 = vpop.xlane.xlu1 %826 }
 0x4ab   : > { %2708 = vrcp.f32 %v827_v41  ;;  %v830_v44 = vpop.xlane.xlu0 %829 }
 0x4ac   : > { %2710 = vrcp.f32 %v830_v44  ;;  %v2273_v44 = vld [vmem:[%s3535_s5 + $0x98] sm:$0xff] }
 0x4ae   : > { %v833_v45 = vpop.xlane.xlu1 %832 }
 0x4af   : > { %2712 = vrcp.f32 %v833_v45  ;;  %v836_v48 = vpop.xlane.xlu0 %835 }
 0x4b0   : > { %2714 = vrcp.f32 %v836_v48  ;;  %v2272_v48 = vld [vmem:[%s3535_s5 + $0x90] sm:$0xff] }
 0x4b2   : > { %v1049_v52 = vpop.permute.xlu1 %1048 }
 0x4b3   : > { %v1097_v54 = vpop.permute.xlu0 %1096  ;;  %v1054_v60 = vsel %vm859_vm2, %v1049_v52, 0 }
 0x4b4   : > { %v1102_v61 = vsel %vm859_vm2, %v1097_v54, 0 }
 0x4b8   : > { %v2709_v49 = vpop.eup %2708 }
 0x4b9   : > { %v2711_v50 = vpop.eup %2710  ;;  %v842_v51 = vmul.f32 %v2709_v49, %v2697_v15  ;;  %v2271_v49 = vld [vmem:[%s3535_s5 + $0x88] sm:$0xff] }
 0x4ba   : > { %v844_v53 = vmul.f32 %v2711_v50, %v2699_v16  ;;  %v2281_v16 = vld [vmem:[%s3535_s5 + $0xd8] sm:$0xff]  ;;  %v2270_v50 = vld [vmem:[%s3535_s5 + $0x80] sm:$0xff] }
 0x4bb   : > { %v851_v55 = vpack.c.bf16 %v842_v51, %v842_v51 }
 0x4bc   : > { %v2713_v56 = vpop.eup %2712  ;;  %v852_v58 = vpack.c.bf16 %v844_v53, %v844_v53 }
 0x4bd   : > { %v2715_v59 = vpop.eup %2714  ;;  %2471 = vmatmul.mubr.msk.bf16.vlgmr.msra.gmra.mxu0 %vm782_vm3, %v851_v55  ;;  %v846_v62 = vmul.f32 %v2713_v56, %v3123_v19 }
 0x4be   : > { %2481 = vmatpush3.bf16.msra.mxu0 %v1054_v60  ;;  %2477 = vmatmul.mubr.msk.bf16.vlgmr.msra.gmra.mxu1 %vm782_vm3, %v852_v58  ;;  %v848_v63 = vmul.f32 %v2715_v59, %v3126_v21  ;;  %v2268_v60 = vld [vmem:[%s3536_s6] ss:$0 sm:$0xff] }
 0x4bf   : > { %2487 = vmatpush3.bf16.msra.mxu1 %v1102_v61  ;;  %2482 = vmatprep.mubr.msk.bf16.mxu0 %vm2813_vm0, %v2812_v1  ;;  %v853_v0 = vpack.c.bf16 %v846_v62, %v846_v62 }
 0x4c0   : > { %2488 = vmatprep.mubr.msk.bf16.mxu1 %vm2813_vm0, %v2812_v1  ;;  %2492 = vmatprep.subr.mxu0 %v2812_v1  ;;  %v854_v2 = vpack.c.bf16 %v848_v63, %v848_v63 }
 0x4c1   : > { %2527 = vmatprep.subr.bf16.mxu1 %v2812_v1 }
 0x4c5   : > { %2483 = vmatmul.mubr.msk.bf16.vlgmr.msra.gmra.mxu0 %vm782_vm3, %v853_v0 }
 0x4c6   : > { %2489 = vmatmul.mubr.msk.bf16.vlgmr.msra.gmra.mxu1 %vm782_vm3, %v854_v2  ;;  %2524 = vmatprep.mubr.msk.f32.mxu0 %vm2813_vm0, %v2812_v1 }
 0x4c7   : > { %2529 = vmatprep.mubr.msk.bf16.mxu1 %vm2813_vm0, %v2812_v1  ;;  %2493 = vmatpush3.msra.mxu0 %v2285_v11 }
 0x4c8   : > { %2494 = vmatprep.subr.mxu0 %v2812_v1 }
 0x4c9   : > { %2495 = vmatpush3.msra.mxu0 %v2284_v12 }
 0x4ca   : > { %2496 = vmatprep.subr.mxu0 %v2812_v1 }
 0x4cb   : > { %2497 = vmatpush3.msra.mxu0 %v2283_v13 }
 0x4cc   : > { %2498 = vmatprep.subr.mxu0 %v2812_v1 }
 0x4cd   : > { %2499 = vmatpush3.msra.mxu0 %v2282_v14 }
 0x4ce   : > { %2500 = vmatprep.subr.mxu0 %v2812_v1 }
 0x4cf   : > { %2501 = vmatpush3.msra.mxu0 %v2281_v16 }
 0x4d0   : > { %2502 = vmatprep.subr.mxu0 %v2812_v1 }
 0x4d1   : > { %2503 = vmatpush3.msra.mxu0 %v2280_v20 }
 0x4d2   : > { %2504 = vmatprep.subr.mxu0 %v2812_v1 }
 0x4d3   : > { %2505 = vmatpush3.msra.mxu0 %v2279_v23 }
 0x4d4   : > { %2506 = vmatprep.subr.mxu0 %v2812_v1 }
 0x4d5   : > { %2507 = vmatpush3.msra.mxu0 %v2278_v25 }
 0x4d6   : > { %2508 = vmatprep.subr.mxu0 %v2812_v1 }
 0x4d7   : > { %2509 = vmatpush3.msra.mxu0 %v2277_v27 }
 0x4d8   : > { %2510 = vmatprep.subr.mxu0 %v2812_v1 }
 0x4d9   : > { %2511 = vmatpush3.msra.mxu0 %v2276_v30 }
 0x4da   : > { %2512 = vmatprep.subr.mxu0 %v2812_v1 }
 0x4db   : > { %2513 = vmatpush3.msra.mxu0 %v2275_v34 }
 0x4dc   : > { %2514 = vmatprep.subr.mxu0 %v2812_v1 }
 0x4dd   : > { %2515 = vmatpush3.msra.mxu0 %v2274_v39 }
 0x4de   : > { %2516 = vmatprep.subr.mxu0 %v2812_v1 }
 0x4df   : > { %2517 = vmatpush3.msra.mxu0 %v2273_v44 }
 0x4e0   : > { %2518 = vmatprep.subr.mxu0 %v2812_v1 }
 0x4e1   : > { %2519 = vmatpush3.msra.mxu0 %v2272_v48 }
 0x4e2   : > { %2520 = vmatprep.subr.mxu0 %v2812_v1 }
 0x4e3   : > { %2521 = vmatpush3.msra.mxu0 %v2271_v49 }
 0x4e4   : > { %2522 = vmatprep.subr.mxu0 %v2812_v1 }
 0x4e5   : > { %2523 = vmatpush3.msra.mxu0 %v2270_v50 }
 0x4e6   : > { %2551 = vmatprep.subr.bf16.mxu0 %v2812_v1 }
 0x548   : > { %v3166_v3 = vpop.f32.mrf.mxu0 }
 0x54a   : > { %v2460_v4 = vpop.f32.mrf.mxu0 }
 0x54c   : > { %v900_v5 = vpop.f32.mrf.mxu0 }
 0x54e   : > { %v2461_v6 = vpop.f32.mrf.mxu0 }
 0x550   : > { %v946_v7 = vpop.f32.mrf.mxu0 }
 0x552   : > { %v2466_v8 = vpop.f32.mrf.mxu0 }
 0x554   : > { %v949_v9 = vpop.f32.mrf.mxu0 }
 0x556   : > { %v2467_v10 = vpop.f32.mrf.mxu0 }
 0x57d   : > { %v994_v15 = vpop.f32.mrf.mxu0 }
 0x57e   : > { %1149 = vrot.lane.b32.xlu0 %v994_v15, %s3545_s27  ;;  %v1042_v17 = vpop.f32.mrf.mxu1  ;;  %s3548_s27 = smov 32  }
 0x57f   : > { %v2472_v19 = vpop.f32.mrf.mxu0  ;;  %1153 = vrot.lane.b32.xlu1 %v1042_v17, %s3546_s29  ;;  %s2824_s29 = smov 8  }
 0x580   : > { %v2478_v21 = vpop.f32.mrf.mxu1 }
 0x581   : > { %v997_v22 = vpop.f32.mrf.mxu0 }
 0x582   : > { %v1045_v24 = vpop.f32.mrf.mxu1 }
 0x583   : > { %v2473_v26 = vpop.f32.mrf.mxu0  ;;  %1145 = vrot.lane.b32.xlu1 %v946_v7, %s2824_s29 }
 0x584   : > { %v2479_v28 = vpop.f32.mrf.mxu1 }
 0x585   : > { %v1090_v29 = vpop.f32.mrf.mxu0 }
 0x586   : > { %1157 = vrot.lane.b32.xlu0 %v1090_v29, %s3548_s27  ;;  %v1138_v32 = vpop.f32.mrf.mxu1  ;;  %s3558_s27 = smov 24  }
 0x587   : > { %v2484_v33 = vpop.f32.mrf.mxu0  ;;  %1161 = vrot.lane.b32.xlu1 %v1138_v32, %s3547_s26  ;;  %s3559_s26 = smov 32  }
 0x588   : > { %v2490_v31 = vpop.f32.mrf.mxu1 }
 0x589   : > { %v1093_v35 = vpop.f32.mrf.mxu0 }
 0x58a   : > { %v1141_v40 = vpop.f32.mrf.mxu1 }
 0x58b   : > { %v2485_v41 = vpop.f32.mrf.mxu0 }
 0x58c   : > { %v2491_v45 = vpop.f32.mrf.mxu1 }
 0x5f0   : > { %v1150_v52 = vpop.permute.xlu0 %1149 }
 0x5f1   : > { %v1154_v51 = vpop.permute.xlu1 %1153 }
 0x5f5   : > { %v1146_v53 = vpop.permute.xlu1 %1145 }
 0x5f6   : > { %v1164_v54 = vsel %vm782_vm3, %v3166_v3, %v1146_v53 }
 0x5f7   : > { %v1166_v55 = vsel %vm1165_vm4, %v1164_v54, %v1150_v52 }
 0x5f8   : > { %v1168_v56 = vsel %vm1167_vm5, %v1166_v55, %v1154_v51  ;;  %v1158_v58 = vpop.permute.xlu0 %1157 }
 0x5f9   : > { %v1170_v59 = vsel %vm1169_vm6, %v1168_v56, %v1158_v58  ;;  %v1162_v61 = vpop.permute.xlu1 %1161 }
 0x5fa   : > { %v1172_v62 = vsel %vm1171_vm7, %v1170_v59, %v1162_v61 }
 0x5fb   : > { %v1174_v63 = vsel %vm1173_vm8, %v1172_v62, 0.0 }
 0x5fc   : > { %v1180_v0 = vadd.f32 %v2268_v60, %v1174_v63 }
 0x5fe   : > { %v1182_v2 = vmin.f32 %v1180_v0, 0.0  ;;  %vm1181_vm9 = vcmp.gt.f32.partialorder %v1180_v0, 0.0 }
 0x600   : > { %v1183_v3 = vmul.f32 1.442695, %v1182_v2 }
 0x602   : > { %2716 = vpow2.f32 %v1183_v3 }
 0x60f   : > { %v2717_v4 = vpop.eup %2716 }
 0x610   : > { %v2269_v5 = vadd.f32 -1.0, %v2717_v4 }
 0x612   : > { %v1186_v6 = vsel %vm1181_vm9, %v1180_v0, %v2269_v5 }
 0x613   : > { %2525 = vmatmul.mubr.f32.vlgmr.msra.gmra.mxu0 %v1186_v6 }
 0x614   : > { %2553 = vmatprep.mubr.msk.bf16.mxu0 %vm2813_vm0, %v2812_v1 }
 0x6d3   : > { %v1270_v7 = vpop.f32.mrf.mxu0 }
 0x6d4   : > { %v3249_v8 = vpack.c.bf16 %v1270_v7, %v1270_v7  ;;  %1352 = vrot.lane.b32.xlu1 %v1270_v7, %s2815_s20  ;;  %1275 = vrot.lane.b32.xlu0 %v1270_v7, %s2814_s12  ;;  %s3553_s12 = smov 104   ;;  %s3554_s20 = smov 112  }
 0x6d5   : > { %v2526_v9 = vpop.f32.mrf.mxu0 }
 0x6d6   : > { %v1566_v10 = vsel %vm859_vm2, %v3249_v8, 0 }
 0x6d7   : > { %2528 = vmatpush3.bf16.msra.mxu1 %v1566_v10 }
 0x6d8   : > { %2533 = vmatprep.subr.bf16.mxu1 %v2812_v1 }
 0x746   : > { %v1276_v11 = vpop.permute.xlu0 %1275  ;;  %v1353_v19 = vpop.permute.xlu1 %1352 }
 0x747   : > { %1278 = vxpose.xlu0.b32.start.end [1/1] (short) (narrow) %v1276_v11, 8 }
 0x7c3   : > { %v1294_v12 = vpop.trf.xlu0 }
 0x7c4   : > { %v1334_v13 = vrot.slane %v1294_v12, %v626_v46  ;;  %v1313_v14 = vrot.slane %v1294_v12, %v3062_v37  ;;  %v1348_v15 = vrot.slane %v1294_v12, %v640_v47  ;;  %v1320_v16 = vrot.slane %v1294_v12, %v612_v38 }
 0x7c5   : > { %v1327_v17 = vrot.slane %v1294_v12, %v619_v42  ;;  %v1341_v46 = vrot.slane %v1294_v12, %v633_v43 }
 0x7c6   : > { %1336 = vbcast.lane.b32.xlu0 %v1334_v13, 256  ;;  %1315 = vbcast.lane.b32.xlu1 %v1313_v14, 256 }
 0x7ca   : > { %1350 = vbcast.lane.b32.xlu0 %v1348_v15, 256  ;;  %1322 = vbcast.lane.b32.xlu1 %v1320_v16, 256 }
 0x7ce   : > { %1329 = vbcast.lane.b32.xlu1 %v1327_v17, 256 }
 0x7f7   : > { %1355 = vxpose.xlu1.b32.start.end [1/1] (short) (narrow) %v1353_v19, 8 }
 0x815   : > { %1343 = vbcast.lane.b32.xlu1 %v1341_v46, 256 }
 0x838   : > { %v1316_v20 = vpop.permute.xlu1 %1315  ;;  %v1337_v39 = vpop.permute.xlu0 %1336 }
 0x83c   : > { %v1323_v21 = vpop.permute.xlu1 %1322  ;;  %v1351_v56 = vpop.permute.xlu0 %1350 }
 0x840   : > { %v1330_v22 = vpop.permute.xlu1 %1329 }
 0x873   : > { %v1371_v23 = vpop.trf.xlu1 }
 0x874   : > { %v1388_v47 = vcombine.high %v1371_v23, %v1371_v23  ;;  %v1395_v24 = vrot.slane %v1371_v23, %v3081_v57 }
 0x876   : > { %v1402_v38 = vrot.slane %v1388_v47, %v3081_v57  ;;  %v1403_v25 = vcombine.high %v1395_v24, %v1395_v24  ;;  %v1411_v26 = vrot.slane %v1395_v24, %v3081_v57 }
 0x878   : > { %v1404_v42 = vcombine.high %v1402_v38, %v1402_v38  ;;  %v1425_v27 = vrot.slane %v1403_v25, %v3081_v57  ;;  %v1433_v28 = vcombine.high %v1411_v26, %v1411_v26  ;;  %v1438_v36 = vrot.slane %v1411_v26, %v3062_v37 }
 0x879   : > { %v1418_v55 = vrot.slane %v1402_v38, %v3081_v57 }
 0x87a   : > { %v1434_v43 = vcombine.high %v1425_v27, %v1425_v27  ;;  %v1442_v29 = vrot.slane %v1425_v27, %v3062_v37  ;;  %v1446_v30 = vrot.slane %v1433_v28, %v3062_v37  ;;  %v1465_v32 = vadd.f32 %v1438_v36, %v1316_v20 }
 0x87b   : > { %v1432_v33 = vrot.slane %v1404_v42, %v3081_v57  ;;  %v1454_v63 = vrot.slane %v1418_v55, %v3062_v37 }
 0x87c   : > { %v1466_v34 = vadd.f32 %v1442_v29, %v1323_v21  ;;  %v1467_v31 = vadd.f32 %v1446_v30, %v1330_v22  ;;  %v1450_v35 = vrot.slane %v1434_v43, %v3062_v37  ;;  %v1471_v40 = vmul.f32 0.2, %v1465_v32 }
 0x87d   : > { %v1458_v52 = vrot.slane %v1432_v33, %v3062_v37 }
 0x87e   : > { %v1472_v41 = vmul.f32 0.2, %v1466_v34  ;;  %v1473_v44 = vmul.f32 0.2, %v1467_v31  ;;  %v1468_v45 = vadd.f32 %v1450_v35, %v1337_v39  ;;  %v1477_v48 = vmax.f32 %v1465_v32, %v1471_v40 }
 0x87f   : > { %v1470_v62 = vadd.f32 %v1458_v52, %v1351_v56 }
 0x880   : > { %v1478_v49 = vmax.f32 %v1466_v34, %v1472_v41  ;;  %v1479_v50 = vmax.f32 %v1467_v31, %v1473_v44  ;;  %v1474_v51 = vmul.f32 0.2, %v1468_v45  ;;  %v1483_v53 = vadd.f32 %v1477_v48, %v3099_v18 }
 0x881   : > { %v1476_v4 = vmul.f32 0.2, %v1470_v62 }
 0x882   : > { %v1484_v54 = vadd.f32 %v1478_v49, %v3099_v18  ;;  %v1489_v58 = vsel %vm782_vm3, %v1483_v53, -inf  ;;  %v1485_v59 = vadd.f32 %v1479_v50, %v3099_v18  ;;  %v1480_v60 = vmax.f32 %v1468_v45, %v1474_v51 }
 0x883   : > { %1490 = vmax.xlane.f32.xlu0 %v1489_v58  ;;  %v1482_v9 = vmax.f32 %v1470_v62, %v1476_v4 }
 0x884   : > { %v1492_v61 = vsel %vm782_vm3, %v1484_v54, -inf  ;;  %v1495_v0 = vsel %vm782_vm3, %v1485_v59, -inf  ;;  %v1486_v3 = vadd.f32 %v1480_v60, %v3099_v18 }
 0x885   : > { %1493 = vmax.xlane.f32.xlu1 %v1492_v61  ;;  %v1488_v37 = vadd.f32 %v1482_v9, %v3099_v18 }
 0x886   : > { %v1498_v6 = vsel %vm782_vm3, %v1486_v3, -inf }
 0x887   : > { %v1344_v2 = vpop.permute.xlu1 %1343  ;;  %1496 = vmax.xlane.f32.xlu0 %v1495_v0  ;;  %v1504_v12 = vsel %vm782_vm3, %v1488_v37, -inf }
 0x888   : > { %v1469_v57 = vadd.f32 %v1454_v63, %v1344_v2 }
 0x88a   : > { %v1475_v5 = vmul.f32 0.2, %v1469_v57 }
 0x88b   : > { %1499 = vmax.xlane.f32.xlu0 %v1498_v6 }
 0x88c   : > { %v1481_v7 = vmax.f32 %v1469_v57, %v1475_v5 }
 0x88e   : > { %v1487_v10 = vadd.f32 %v1481_v7, %v3099_v18 }
 0x890   : > { %v1501_v11 = vsel %vm782_vm3, %v1487_v10, -inf }
 0x891   : > { %1502 = vmax.xlane.f32.xlu0 %v1501_v11 }
 0x895   : > { %1505 = vmax.xlane.f32.xlu0 %v1504_v12 }
 0x896   : > { %1609 = vrot.lane.b32.xlu1 %v3249_v8, %s2817_s18  ;;  %s3555_s18 = smov 96  }
 0x90c   : > { %v1491_v13 = vpop.xlane.xlu0 %1490 }
 0x90d   : > { %v1507_v14 = vsub.f32 %v1483_v53, %v1491_v13 }
 0x90e   : > { %v1494_v15 = vpop.xlane.xlu1 %1493 }
 0x90f   : > { %v1508_v16 = vsub.f32 %v1484_v54, %v1494_v15  ;;  %v1513_v17 = vmul.f32 1.442695, %v1507_v14 }
 0x910   : > { %v1497_v46 = vpop.xlane.xlu0 %1496 }
 0x911   : > { %v1515_v19 = vmul.f32 1.442695, %v1508_v16  ;;  %2718 = vpow2.f32 %v1513_v17  ;;  %v1509_v20 = vsub.f32 %v1485_v59, %v1497_v46 }
 0x912   : > { %v1610_v40 = vpop.permute.xlu1 %1609 }
 0x913   : > { %2720 = vpow2.f32 %v1515_v19  ;;  %v1517_v21 = vmul.f32 1.442695, %v1509_v20  ;;  %v1615_v52 = vsel %vm859_vm2, %v1610_v40, 0 }
 0x914   : > { %v1500_v25 = vpop.xlane.xlu0 %1499 }
 0x915   : > { %2722 = vpow2.f32 %v1517_v21  ;;  %v1510_v42 = vsub.f32 %v1486_v3, %v1500_v25 }
 0x917   : > { %v1519_v36 = vmul.f32 1.442695, %v1510_v42 }
 0x919   : > { %2724 = vpow2.f32 %v1519_v36 }
 0x91a   : > { %v1503_v26 = vpop.xlane.xlu0 %1502 }
 0x91b   : > { %v1511_v28 = vsub.f32 %v1487_v10, %v1503_v26 }
 0x91d   : > { %v1521_v29 = vmul.f32 1.442695, %v1511_v28 }
 0x91e   : > { %v2719_v18 = vpop.eup %2718  ;;  %v1506_v27 = vpop.xlane.xlu0 %1505 }
 0x91f   : > { %v1525_v23 = vsel %vm782_vm3, %v2719_v18, 0.0  ;;  %v1512_v43 = vsub.f32 %v1488_v37, %v1506_v27  ;;  %2726 = vpow2.f32 %v1521_v29 }
 0x920   : > { %v2721_v22 = vpop.eup %2720  ;;  %1526 = vadd.xlane.f32.xlu1 %v1525_v23 }
 0x921   : > { %v1528_v47 = vsel %vm782_vm3, %v2721_v22, 0.0  ;;  %v1523_v30 = vmul.f32 1.442695, %v1512_v43 }
 0x922   : > { %1529 = vadd.xlane.f32.xlu0 %v1528_v47  ;;  %v2723_v24 = vpop.eup %2722 }
 0x923   : > { %v1531_v38 = vsel %vm782_vm3, %v2723_v24, 0.0  ;;  %2728 = vpow2.f32 %v1523_v30 }
 0x924   : > { %1532 = vadd.xlane.f32.xlu1 %v1531_v38 }
 0x926   : > { %v2725_v32 = vpop.eup %2724 }
 0x927   : > { %v1534_v34 = vsel %vm782_vm3, %v2725_v32, 0.0 }
 0x92c   : > { %v2727_v33 = vpop.eup %2726 }
 0x92d   : > { %v1537_v35 = vsel %vm782_vm3, %v2727_v33, 0.0 }
 0x930   : > { %v3301_v31 = vpop.eup %2728 }
 0x931   : > { %v1540_v39 = vsel %vm782_vm3, %v3301_v31, 0.0 }
 0x935   : > { %1705 = vrot.lane.b32.xlu1 %v3249_v8, %s3553_s12 }
 0x938   : > { %1657 = vrot.lane.b32.xlu0 %v3249_v8, %s3554_s20 }
 0x957   : > { %1535 = vadd.xlane.f32.xlu0 %v1534_v34  ;;  %v2001_v34 = vld [vmem:[%s3538_s8 + $0x70] sm:$0xff] }
 0x959   : > { %1538 = vadd.xlane.f32.xlu1 %v1537_v35 }
 0x95b   : > { %1541 = vadd.xlane.f32.xlu0 %v1540_v39  ;;  %v1999_v39 = vld [vmem:[%s3538_s8 + $0x60] sm:$0xff] }
 0x96a   : > { %1753 = vrot.lane.b32.xlu1 %v3249_v8, %s3555_s18  ;;  %s2827_s18 = smov [#allocation2]  }
 0x971   : > { %1801 = vrot.lane.b32.xlu0 %v3249_v8, %s3556_s25  ;;  %s2754_s25 = sshll.u32 %s2827_s18, 4  ;;  %s2755_s25 = int_to_ptr.vmem [resolvable:$false] %s2754_s25 }
 0x9a9   : > { %v1527_v41 = vpop.xlane.xlu1 %1526 }
 0x9aa   : > { %2730 = vrcp.f32 %v1527_v41  ;;  %v1998_v41 = vld [vmem:[%s3538_s8 + $0x58] sm:$0xff] }
 0x9ab   : > { %v1530_v44 = vpop.xlane.xlu0 %1529 }
 0x9ac   : > { %2732 = vrcp.f32 %v1530_v44  ;;  %v1997_v44 = vld [vmem:[%s3538_s8 + $0x50] sm:$0xff] }
 0x9ad   : > { %v1533_v45 = vpop.xlane.xlu1 %1532 }
 0x9ae   : > { %2734 = vrcp.f32 %v1533_v45  ;;  %v1996_v45 = vld [vmem:[%s3538_s8 + $0x48] sm:$0xff] }
 0x9af   : > { %v1658_v53 = vpop.permute.xlu0 %1657 }
 0x9b0   : > { %v1663_v56 = vsel %vm859_vm2, %v1658_v53, 0 }
 0x9b1   : > { %v1706_v59 = vpop.permute.xlu1 %1705 }
 0x9b2   : > { %v1711_v61 = vsel %vm859_vm2, %v1706_v59, 0 }
 0x9b7   : > { %v2731_v48 = vpop.eup %2730 }
 0x9b8   : > { %v1544_v49 = vmul.f32 %v2731_v48, %v2719_v18  ;;  %v1995_v48 = vld [vmem:[%s3538_s8 + $0x40] sm:$0xff] }
 0x9b9   : > { %v2733_v51 = vpop.eup %2732 }
 0x9ba   : > { %v1555_v50 = vpack.c.bf16 %v1544_v49, %v1544_v49  ;;  %v1546_v8 = vmul.f32 %v2733_v51, %v2721_v22  ;;  %v1994_v49 = vld [vmem:[%s3538_s8 + $0x38] sm:$0xff]  ;;  %v1992_v51 = vld [vmem:[%s3538_s8 + $0x28] sm:$0xff] }
 0x9bb   : > { %v2735_v55 = vpop.eup %2734 }
 0x9bc   : > { %2530 = vmatmul.mubr.msk.bf16.vlgmr.msra.gmra.mxu1 %vm782_vm3, %v1555_v50  ;;  %v1556_v54 = vpack.c.bf16 %v1546_v8, %v1546_v8  ;;  %v1548_v58 = vmul.f32 %v2735_v55, %v2723_v24  ;;  %v1993_v50 = vld [vmem:[%s3538_s8 + $0x30] sm:$0xff]  ;;  %v1990_v8 = vld [vmem:[%s3538_s8 + $0x18] sm:$0xff] }
 0x9bd   : > { %2534 = vmatpush3.bf16.msra.mxu1 %v1615_v52  ;;  %2535 = vmatprep.mubr.msk.bf16.mxu1 %vm2813_vm0, %v2812_v1  ;;  %v1991_v52 = vld [vmem:[%s3538_s8 + $0x20] sm:$0xff] }
 0x9be   : > { %2539 = vmatprep.subr.bf16.mxu1 %v2812_v1  ;;  %v1557_v60 = vpack.c.bf16 %v1548_v58, %v1548_v58 }
 0x9c4   : > { %2536 = vmatmul.mubr.msk.bf16.vlgmr.msra.gmra.mxu1 %vm782_vm3, %v1556_v54 }
 0x9c5   : > { %2540 = vmatpush3.bf16.msra.mxu1 %v1663_v56  ;;  %2541 = vmatprep.mubr.msk.bf16.mxu1 %vm2813_vm0, %v2812_v1 }
 0x9c6   : > { %2545 = vmatprep.subr.bf16.mxu1 %v2812_v1 }
 0x9cc   : > { %2542 = vmatmul.mubr.msk.bf16.vlgmr.msra.gmra.mxu1 %vm782_vm3, %v1557_v60 }
 0x9cd   : > { %2546 = vmatpush3.bf16.msra.mxu1 %v1711_v61  ;;  %2547 = vmatprep.mubr.msk.bf16.mxu1 %vm2813_vm0, %v2812_v1 }
 0x9ce   : > { %2557 = vmatprep.subr.bf16.mxu1 %v2812_v1 }
 0x9e0   : > { %v1536_v62 = vpop.xlane.xlu0 %1535 }
 0x9e1   : > { %2736 = vrcp.f32 %v1536_v62  ;;  %v2292_v62 = vld [vmem:[%s3536_s6 + $0x1] ss:$0 sm:$0xff] }
 0x9e2   : > { %v1539_v63 = vpop.xlane.xlu1 %1538 }
 0x9e3   : > { %2738 = vrcp.f32 %v1539_v63 }
 0x9e4   : > { %v1542_v0 = vpop.xlane.xlu0 %1541 }
 0x9e5   : > { %2740 = vrcp.f32 %v1542_v0 }
 0x9e6   : > { %v1754_v2 = vpop.permute.xlu1 %1753 }
 0x9e7   : > { %v1759_v3 = vsel %vm859_vm2, %v1754_v2, 0 }
 0x9e8   : > { %2552 = vmatpush3.bf16.msra.mxu0 %v1759_v3  ;;  %v1802_v5 = vpop.permute.xlu0 %1801 }
 0x9e9   : > { %2563 = vmatprep.subr.mxu0 %v2812_v1  ;;  %v1807_v11 = vsel %vm859_vm2, %v1802_v5, 0 }
 0x9ee   : > { %v2737_v57 = vpop.eup %2736 }
 0x9ef   : > { %v1550_v4 = vmul.f32 %v2737_v57, %v2725_v32 }
 0x9f0   : > { %v2739_v6 = vpop.eup %2738 }
 0x9f1   : > { %v1558_v7 = vpack.c.bf16 %v1550_v4, %v1550_v4  ;;  %v1552_v10 = vmul.f32 %v2739_v6, %v2727_v33  ;;  %v2002_v33 = vld [vmem:[%s3538_s8 + $0x78] sm:$0xff] }
 0x9f2   : > { %v2741_v9 = vpop.eup %2740 }
 0x9f3   : > { %2548 = vmatmul.mubr.msk.bf16.vlgmr.msra.gmra.mxu1 %vm782_vm3, %v1558_v7  ;;  %v1559_v37 = vpack.c.bf16 %v1552_v10, %v1552_v10  ;;  %v1554_v12 = vmul.f32 %v2741_v9, %v3301_v31  ;;  %v2000_v31 = vld [vmem:[%s3538_s8 + $0x68] sm:$0xff]  ;;  %v1986_v9 = vld [vmem:[%s3537_s7 + $0x78] sm:$0xff]  ;;  %v1985_v10 = vld [vmem:[%s3537_s7 + $0x70] sm:$0xff] }
 0x9f4   : > { %2558 = vmatpush3.bf16.msra.mxu1 %v1807_v11  ;;  %2559 = vmatprep.mubr.msk.bf16.mxu1 %vm2813_vm0, %v2812_v1  ;;  %v1984_v11 = vld [vmem:[%s3537_s7 + $0x68] sm:$0xff] }
 0x9f5   : > { %2568 = vmatprep.subr.mxu1 %v2812_v1  ;;  %2554 = vmatmul.mubr.msk.bf16.vlgmr.msra.gmra.mxu0 %vm782_vm3, %v1559_v37  ;;  %v1560_v13 = vpack.c.bf16 %v1554_v12, %v1554_v12  ;;  %v1983_v37 = vld [vmem:[%s3537_s7 + $0x60] sm:$0xff]  ;;  %v1982_v12 = vld [vmem:[%s3537_s7 + $0x58] sm:$0xff] }
 0x9f6   : > { %2565 = vmatprep.mubr.msk.f32.mxu0 %vm2813_vm0, %v2812_v1 }
 0x9fb   : > { %2560 = vmatmul.mubr.msk.bf16.vlgmr.msra.gmra.mxu1 %vm782_vm3, %v1560_v13  ;;  %v1981_v13 = vld [vmem:[%s3537_s7 + $0x50] sm:$0xff] }
 0x9fc   : > { %2600 = vmatprep.mubr.msk.f32.mxu1 %vm2813_vm0, %v2812_v1  ;;  %2569 = vmatpush3.msra.mxu1 %v2002_v33 }
 0x9fd   : > { %2570 = vmatprep.subr.mxu1 %v2812_v1 }
 0x9fe   : > { %2571 = vmatpush3.msra.mxu1 %v2001_v34 }
 0x9ff   : > { %2572 = vmatprep.subr.mxu1 %v2812_v1 }
 0xa00   : > { %2573 = vmatpush3.msra.mxu1 %v2000_v31 }
 0xa01   : > { %2574 = vmatprep.subr.mxu1 %v2812_v1 }
 0xa02   : > { %2575 = vmatpush3.msra.mxu1 %v1999_v39 }
 0xa03   : > { %2576 = vmatprep.subr.mxu1 %v2812_v1 }
 0xa04   : > { %2577 = vmatpush3.msra.mxu1 %v1998_v41 }
 0xa05   : > { %2578 = vmatprep.subr.mxu1 %v2812_v1 }
 0xa06   : > { %2579 = vmatpush3.msra.mxu1 %v1997_v44 }
 0xa07   : > { %2580 = vmatprep.subr.mxu1 %v2812_v1 }
 0xa08   : > { %2581 = vmatpush3.msra.mxu1 %v1996_v45 }
 0xa09   : > { %2582 = vmatprep.subr.mxu1 %v2812_v1 }
 0xa0a   : > { %2583 = vmatpush3.msra.mxu1 %v1995_v48 }
 0xa0b   : > { %2584 = vmatprep.subr.mxu1 %v2812_v1 }
 0xa0c   : > { %2585 = vmatpush3.msra.mxu1 %v1994_v49 }
 0xa0d   : > { %2586 = vmatprep.subr.mxu1 %v2812_v1 }
 0xa0e   : > { %2587 = vmatpush3.msra.mxu1 %v1993_v50 }
 0xa0f   : > { %2588 = vmatprep.subr.mxu1 %v2812_v1 }
 0xa10   : > { %2589 = vmatpush3.msra.mxu1 %v1992_v51 }
 0xa11   : > { %2590 = vmatprep.subr.mxu1 %v2812_v1 }
 0xa12   : > { %2591 = vmatpush3.msra.mxu1 %v1991_v52 }
 0xa13   : > { %2592 = vmatprep.subr.mxu1 %v2812_v1 }
 0xa14   : > { %2593 = vmatpush3.msra.mxu1 %v1990_v8 }
 0xa15   : > { %2594 = vmatprep.subr.mxu1 %v2812_v1 }
 0xa7c   : > { %v3339_v14 = vpop.f32.mrf.mxu1 }
 0xa7e   : > { %v2531_v15 = vpop.f32.mrf.mxu1 }
 0xa7f   : > { %v1979_v15 = vld [vmem:[%s3537_s7 + $0x40] sm:$0xff] }
 0xa80   : > { %v1605_v16 = vpop.f32.mrf.mxu1 }
 0xa81   : > { %v1978_v16 = vld [vmem:[%s3537_s7 + $0x38] sm:$0xff] }
 0xa82   : > { %v2532_v17 = vpop.f32.mrf.mxu1 }
 0xa83   : > { %v1977_v17 = vld [vmem:[%s3537_s7 + $0x30] sm:$0xff] }
 0xa84   : > { %v1651_v19 = vpop.f32.mrf.mxu1 }
 0xa85   : > { %1850 = vrot.lane.b32.xlu1 %v1651_v19, %s2824_s29  ;;  %s3560_s29 = smov 40   ;;  %v1976_v19 = vld [vmem:[%s3537_s7 + $0x28] sm:$0xff] }
 0xa86   : > { %v2537_v46 = vpop.f32.mrf.mxu1 }
 0xa87   : > { %v1975_v46 = vld [vmem:[%s3537_s7 + $0x20] sm:$0xff] }
 0xa88   : > { %v1654_v20 = vpop.f32.mrf.mxu1 }
 0xa89   : > { %v1974_v20 = vld [vmem:[%s3537_s7 + $0x18] sm:$0xff] }
 0xa8a   : > { %v2538_v21 = vpop.f32.mrf.mxu1 }
 0xa8b   : > { %v1973_v21 = vld [vmem:[%s3537_s7 + $0x10] sm:$0xff] }
 0xa8c   : > { %v1699_v18 = vpop.f32.mrf.mxu1 }
 0xa8d   : > { %1854 = vrot.lane.b32.xlu0 %v1699_v18, %s3557_s11  ;;  %v1972_v18 = vld [vmem:[%s3537_s7 + $0x8] sm:$0xff]  ;;  %s374_s11 = sand.u32 1, %s2802_s14  }
 0xa8e   : > { %v2543_v22 = vpop.f32.mrf.mxu1  ;;  %s375_s21 = scalar_lea.vmem [#allocation2], %s374_s11  ;;  %s2162_s12 = scalar_lea.sflag [#allocation3], %s374_s11 }
 0xa8f   : > { %v1989_v22 = vld [vmem:[%s3538_s8 + $0x10] sm:$0xff] }
 0xa90   : > { %v1702_v23 = vpop.f32.mrf.mxu1  ;;  %2595 = vmatpush3.msra.mxu1 %v1989_v22 }
 0xa91   : > { %v1971_v23 = vld [vmem:[%s3537_s7] sm:$0xff]  ;;  %2596 = vmatprep.subr.mxu1 %v2812_v1 }
 0xa92   : > { %v2544_v47 = vpop.f32.mrf.mxu1 }
 0xa93   : > { %v1988_v47 = vld [vmem:[%s3538_s8 + $0x8] sm:$0xff] }
 0xa94   : > { %2597 = vmatpush3.msra.mxu1 %v1988_v47 }
 0xa95   : > { %2598 = vmatprep.subr.mxu1 %v2812_v1 }
 0xab3   : > { %v1747_v24 = vpop.f32.mrf.mxu1 }
 0xab4   : > { %1858 = vrot.lane.b32.xlu1 %v1747_v24, %s3558_s27  ;;  %s387_s27 = scalar_lea.vmem %s3532_s2, %s2259_s28  ;;  %v1987_v24 = vld [vmem:[%s3538_s8] sm:$0xff] }
 0xab5   : > { %v2549_v38 = vpop.f32.mrf.mxu1  ;;  %v1795_v25 = vpop.f32.mrf.mxu0  ;;  %v390_v35 = vld [vmem:[%s387_s27] sm:$0x3]  ;;  %2599 = vmatpush3.msra.mxu1 %v1987_v24  ;;  %s2296_s27 = sshll.u32 %s2904_s17, 4  ;;  %s2756_s17 = scalar_lea.vmem %s2755_s25, 32 }
 0xab6   : > { %1862 = vrot.lane.b32.xlu0 %v1795_v25, %s3559_s26  ;;  %v1961_v40 = vsel %vm1960_vm10, %v390_v35, 0.0  ;;  %s2174_s26 = sshll.u32 %s375_s21, 4  ;;  %s2172_s28 = scalar_lea.hbm %s3540_s10, %s2296_s27  ;;  %s2175_s26 = int_to_ptr.vmem [resolvable:$true] %s2174_s26 }
 0xab7   : > { %v1750_v26 = vpop.f32.mrf.mxu1  ;;  %v2555_v42 = vpop.f32.mrf.mxu0  ;;  %s2750_s20 = scalar_lea.vmem %s2175_s26, 16  ;;  %p2757_p0 = scmp.lt.s32.totalorder %s2175_s26, %s2755_s25 }
 0xab8   : > { %p2751_p11 = scmp.ne.s32.totalorder %s2175_s26, %s2750_s20  ;;  %p2758_p1 = scmp.lt.s32.totalorder %s2756_s17, %s2750_s20 }
 0xab9   : > { %v2550_v27 = vpop.f32.mrf.mxu1  ;;  %v1798_v28 = vpop.f32.mrf.mxu0 }
 0xaba   : > { %p2752_p12 = pnand %p2751_p11, %p2921_p5  ;;  %p2759_p2 = por %p2758_p1, %p2757_p0 }
 0xabb   : > { %v1843_v36 = vpop.f32.mrf.mxu1  ;;  %v2556_v43 = vpop.f32.mrf.mxu0 }
 0xabc   : > { %1866 = vrot.lane.b32.xlu1 %v1843_v36, %s3560_s29  ;;  %p2753_p13 = pneg %p2752_p12 }
 0xabd   : > { %v2561_v29 = vpop.f32.mrf.mxu1 }
 0xabe   : > { %p2760_p3 = pnand %p2759_p2, %p2753_p13 }
 0xabf   : > { %v1846_v30 = vpop.f32.mrf.mxu1 }
 0xac1   : > { %v2562_v32 = vpop.f32.mrf.mxu1 }
 0xad5   : > { %1962 = vadd.xlane.f32.xlu0 %v1961_v40 }
 0xaf7   : > { %v1851_v53 = vpop.permute.xlu1 %1850 }
 0xaf8   : > { %v1869_v56 = vsel %vm782_vm3, %v3339_v14, %v1851_v53  ;;  %v1980_v14 = vld [vmem:[%s3537_s7 + $0x48] sm:$0xff] }
 0xaff   : > { %v1855_v54 = vpop.permute.xlu0 %1854 }
 0xb00   : > { %v1870_v58 = vsel %vm1165_vm4, %v1869_v56, %v1855_v54 }
 0xb26   : > { %v1859_v55 = vpop.permute.xlu1 %1858 }
 0xb27   : > { %v1871_v59 = vsel %vm1167_vm5, %v1870_v58, %v1859_v55 }
 0xb28   : > { %v1863_v60 = vpop.permute.xlu0 %1862 }
 0xb29   : > { %v1872_v61 = vsel %vm1169_vm6, %v1871_v59, %v1863_v60 }
 0xb2e   : > { %v1867_v63 = vpop.permute.xlu1 %1866 }
 0xb2f   : > { %v1873_v0 = vsel %vm1171_vm7, %v1872_v61, %v1867_v63 }
 0xb30   : > { %v1874_v2 = vsel %vm1173_vm8, %v1873_v0, 0.0 }
 0xb31   : > { %v1880_v3 = vadd.f32 %v2292_v62, %v1874_v2 }
 0xb33   : > { %v1882_v57 = vmin.f32 %v1880_v3, 0.0  ;;  %vm1881_vm11 = vcmp.gt.f32.partialorder %v1880_v3, 0.0 }
 0xb35   : > { %v1883_v4 = vmul.f32 1.442695, %v1882_v57 }
 0xb37   : > { %2742 = vpow2.f32 %v1883_v4 }
 0xb44   : > { %v2743_v5 = vpop.eup %2742 }
 0xb45   : > { %v2293_v6 = vadd.f32 -1.0, %v2743_v5 }
 0xb47   : > { %v1886_v7 = vsel %vm1881_vm11, %v1880_v3, %v2293_v6 }
 0xb48   : > { %2564 = vmatpush3.msra.mxu0 %v1886_v7 }
 0xb49   : > { %2566 = vmatmul.mubr.msk.f32.vlgmr.msra.gmra.mxu0 %vm782_vm3, %v390_v35  ;;  %2603 = vmatprep.subr.mxu0 %v2812_v1 }
 0xb4a   : > { %2604 = vmatpush3.msra.mxu0 %v1986_v9  ;;  %2635 = vmatprep.mubr.msk.f32.mxu0 %vm2813_vm0, %v2812_v1 }
 0xb4b   : > { %2605 = vmatprep.subr.mxu0 %v2812_v1 }
 0xb4c   : > { %2606 = vmatpush3.msra.mxu0 %v1985_v10 }
 0xb4d   : > { %2607 = vmatprep.subr.mxu0 %v2812_v1 }
 0xb4e   : > { %2608 = vmatpush3.msra.mxu0 %v1984_v11 }
 0xb4f   : > { %2609 = vmatprep.subr.mxu0 %v2812_v1 }
 0xb50   : > { %2610 = vmatpush3.msra.mxu0 %v1983_v37 }
 0xb51   : > { %2611 = vmatprep.subr.mxu0 %v2812_v1 }
 0xb52   : > { %2612 = vmatpush3.msra.mxu0 %v1982_v12 }
 0xb53   : > { %2613 = vmatprep.subr.mxu0 %v2812_v1 }
 0xb54   : > { %2614 = vmatpush3.msra.mxu0 %v1981_v13 }
 0xb55   : > { %2615 = vmatprep.subr.mxu0 %v2812_v1 }
 0xb56   : > { %2616 = vmatpush3.msra.mxu0 %v1980_v14 }
 0xb57   : > { %2617 = vmatprep.subr.mxu0 %v2812_v1 }
 0xb58   : > { %2618 = vmatpush3.msra.mxu0 %v1979_v15 }
 0xb59   : > { %2619 = vmatprep.subr.mxu0 %v2812_v1 }
 0xb5a   : > { %2620 = vmatpush3.msra.mxu0 %v1978_v16 }
 0xb5b   : > { %2621 = vmatprep.subr.mxu0 %v2812_v1 }
 0xb5c   : > { %2622 = vmatpush3.msra.mxu0 %v1977_v17 }
 0xb5d   : > { %2623 = vmatprep.subr.mxu0 %v2812_v1 }
 0xb5e   : > { %2624 = vmatpush3.msra.mxu0 %v1976_v19  ;;  %v1963_v38 = vpop.xlane.xlu0 %1962 }
 0xb5f   : > { %2625 = vmatprep.subr.mxu0 %v2812_v1  ;;  %v1965_v25 = vmax.f32 %v1963_v38, 1.0  ;;  %vm1964_vm12 = vcmp.gt.f32.partialorder %v1963_v38, 0.0 }
 0xb60   : > { %2626 = vmatpush3.msra.mxu0 %v1975_v46 }
 0xb61   : > { %2627 = vmatprep.subr.mxu0 %v2812_v1  ;;  %2744 = vrcp.f32 %v1965_v25 }
 0xb62   : > { %2628 = vmatpush3.msra.mxu0 %v1974_v20 }
 0xb63   : > { %2629 = vmatprep.subr.mxu0 %v2812_v1 }
 0xb64   : > { %2630 = vmatpush3.msra.mxu0 %v1973_v21 }
 0xb65   : > { %2631 = vmatprep.subr.mxu0 %v2812_v1 }
 0xb66   : > { %2632 = vmatpush3.msra.mxu0 %v1972_v18 }
 0xb67   : > { %2633 = vmatprep.subr.mxu0 %v2812_v1  ;;  %v2146_v1 = vld [vmem:[%s3539_s9] sm:$0x1] }
 0xb68   : > { %2634 = vmatpush3.msra.mxu0 %v1971_v23 }
 0xb6e   : > { %v2745_v26 = vpop.eup %2744 }
 0xc09   : > { %v1956_v42 = vpop.f32.mrf.mxu0 }
 0xc0a   : > { %v1967_v27 = vmul.f32 %v2745_v26, %v1956_v42 }
 0xc0b   : > { %v2567_v28 = vpop.f32.mrf.mxu0 }
 0xc0c   : > { %v1970_v36 = vsel %vm1964_vm12, %v1967_v27, 0.0  ;;  %2636 = vmatmul.mubr.msk.f32.vlgmr.msra.gmra.mxu0 %vm1964_vm12, %v1967_v27 }
 0xc0d   : > { %v2004_v43 = vrot.slane %v1970_v36, 1 }
 0xc0f   : > { %2601 = vmatmul.mubr.f32.vlgmr.msra.gmra.mxu1 %v2004_v43 }
 0xccc   : > { %v2142_v29 = vpop.f32.mrf.mxu0 }
 0xcce   : > { %v2637_v30 = vpop.f32.mrf.mxu0 }
 0xccf   : > { %v2072_v32 = vpop.f32.mrf.mxu1 }
 0xcd0   : > { %v2143_v33 = vadd.f32 %v2142_v29, %v2072_v32 }
 0xcd1   : > { %v2602_v34 = vpop.f32.mrf.mxu1 }
 0xcd2   : > { %v2147_v31 = vadd.f32 %v2146_v1, %v2143_v33 }
 0xcd4   : > { %v2149_v35 = vsel %vm2148_vm13, %v2147_v31, -inf }
 0xcd5   : > { %2150 = vmax.xlane.f32.xlu1 %v2149_v35 }
 0xd5e   : > { %v2151_v39 = vpop.xlane.xlu1 %2150 }
 0xd5f   : > { %v2152_v40 = vsub.f32 %v2147_v31, %v2151_v39 }
 0xd61   : > { %v2153_v41 = vmul.f32 1.442695, %v2152_v40 }
 0xd63   : > { %2746 = vpow2.f32 %v2153_v41 }
 0xd70   : > { %v2747_v44 = vpop.eup %2746 }
 0xd71   : > { %v2155_v45 = vsel %vm2148_vm13, %v2747_v44, 0.0 }
 0xd72   : > { %2156 = vadd.xlane.f32.xlu0 %v2155_v45 }
 0xdfb   : > { %v2157_v48 = vpop.xlane.xlu0 %2156 }
 0xdfc   : > { %2748 = vrcp.f32 %v2157_v48 }
 0xe09   : > { %v2749_v49 = vpop.eup %2748 }
 0xe0a   : > { %v2159_v50 = vmul.f32 %v2749_v49, %v2747_v44 }
 0xe0c   : > { %2160 = vst.msk [vmem:[%s375_s21] sm:$0x1] %vm2148_vm13, %v2159_v50 }
 0xe0d   : > { %2763 = shalt.err (!%p2760_p3)
}
 0xe0e   : > { %s2764_s29 = scalar_lea.hbm %s2172_s28, 16  ;;  %s2768_s21 = scalar_lea.hbm %s3540_s10, 32 }
 0xe0f   : > { %p2765_p4 = scmp.ne.s32.totalorder %s2172_s28, %s2764_s29  ;;  %p2769_p9 = scmp.lt.s32.totalorder %s2172_s28, %s3540_s10 }
 0xe10   : > { %p2770_p10 = scmp.lt.s32.totalorder %s2768_s21, %s2764_s29 }
 0xe11   : > { %p2766_p7 = pnand %p2765_p4, %p2921_p5 }
 0xe12   : > { %p2771_p11 = por %p2770_p10, %p2769_p9 }
 0xe13   : > { %p2767_p8 = pneg %p2766_p7 }
 0xe15   : > { %p2772_p12 = pnand %p2771_p11, %p2767_p8 }
 0xe17   : > { %2775 = shalt.err (!%p2772_p12)
}
 0xe18   : > { %2638 = dma.vmem_to_hbm [thread:$0]  (%p2921_p5), %s2175_s26, 16, %s2172_s28, %s2162_s12  }
 0xe19 PF: > { %p2644_p13 = scmp.ge.s32.totalorder %s2810_s16, 2  ;;  %s2186_s20 = sand.u32 1, %s2798_s13  }
 0xe1a   : > { %s2187_s18 = scalar_lea.sflag [#allocation3], %s2186_s20 }
 0xe1b   : > { %p2641_p0 = pnand %p2644_p13, %p2925_p6 }
 0xe1d   : > { %p2642_p1 = pneg %p2641_p0 }
 0xe1f   : > { %2793 = dma.done.wait (%p2642_p1), %s2187_s18, 16  }
 0xe20   : > { %2795 = vsyncadd (%p2642_p1), %s2187_s18, 4294967280  ;;  %p20_p2 = scmp.ge.s32.totalorder %s2908_s19, 4   ;;  %s3561_s13 = smov %s2802_s14 }
 0xe21   : > { %s3562_s14 = smov %s2806_s15  ;;  %s3563_s15 = smov %s2919_s22 }
 0xe22   : > { %s3564_s16 = smov %s2908_s19  ;;  %22 = sbr.rel (!%p20_p2) target bundleno = 5 (0x5), region = 102 }
 0xe27   :  { %2191 = vsyncpa [#allocation3], 1 }
 0xe28   :  { %2193 = vsyncpa [#allocation3 + $0x1], 1 }

</bundles_post_ra>
